<compile_context>
chip_gen: v7x
topology: tpu7x:2x2x1
jax: 0.10.0
libtpu: 0.0.40
codegen_flags: <defaults>
</compile_context>

<pallas_src>
import functools

import jax
import jax.numpy as jnp
from jax.experimental import pallas as pl
from jax.experimental.pallas import tpu as pltpu


# -----------------------------------------------------------------------------
# Static layer planning (pure Python shape math, no tracing)
# -----------------------------------------------------------------------------
def _conv_out_len(L, K, dil, stride, pad):
    return (L + 2 * pad - dil * (K - 1) - 1) // stride + 1


def _build_plan(T, depth, stride_t, dil_rate):
    """Per-layer static conv specs for encoder and decoder stacks.

    The decoder's final ConvTranspose1d(K=2*stride_t, stride=stride_t,
    padding=stride_t//2) is phase-decomposed into stride_t stride-1 convs over
    a 1-padded input and fused with the output projection, so it shows up here
    as a plain 3-tap stride-1 conv spec (its weight/bias are pre-fused in the
    wrapper and its output has stride_t * 128 lane-dense columns)."""
    enc, dec = [], []
    L = T
    for i in range(depth):
        d = dil_rate ** i
        s = stride_t if i == 0 else 1
        Lo = _conv_out_len(L, 3, d, s, d)
        enc.append(dict(L_in=L, L_out=Lo, K=3, dil=d, stride=s, pad=d, relu=True))
        L = Lo
    Tq = L
    for i in range(depth - 1):
        d = dil_rate ** (depth - 1 - i)
        Lo = _conv_out_len(L, 3, d, 1, d)
        dec.append(dict(L_in=L, L_out=Lo, K=3, dil=d, stride=1, pad=d, relu=True))
        L = Lo
    dec.append(dict(L_in=L, L_out=L, K=3, dil=1, stride=1, pad=1, relu=False))
    T_out = stride_t * L            # exact for even stride_t
    return enc, dec, Tq, T_out


# -----------------------------------------------------------------------------
# Fused kernel (encoder -> VQ -> decoder), everything VMEM-resident
# -----------------------------------------------------------------------------
def _make_fused_kernel(*, B, T, F, W, depth, nb_code,
                       enc_plan, dec_plan, Tq, Td, out_cols):

    def kernel(*refs):
        it = iter(refs)
        motion_ref = next(it)
        enc_in_w, enc_in_b = next(it), next(it)
        enc_conv = [(next(it), next(it)) for _ in range(depth)]
        enc_out_w, enc_out_b = next(it), next(it)
        cbT_ref, cb_ref, cb_sq_ref = next(it), next(it), next(it)
        dec_in_w, dec_in_b = next(it), next(it)
        dec_conv = [(next(it), next(it)) for _ in range(depth)]  # last = fused convT+proj
        recon_ref, codes_ref, loss_ref, perp_ref = (next(it), next(it),
                                                    next(it), next(it))
        pad_ref = next(it)

        def mm(a, b):
            return jnp.dot(a, b, preferred_element_type=jnp.float32)

        def linear(x, w_ref, b_ref, relu=False):
            y = mm(x.astype(jnp.bfloat16), w_ref[...]) + b_ref[...]
            return jnp.maximum(y, 0.0) if relu else y

        def conv(x, spec, w_ref, b_ref):
            """x: (B*L_in, W) f32 -> (B*L_out, cols) f32 via ONE wide MXU dot."""
            L_in, L_out = spec["L_in"], spec["L_out"]
            K, d, s, p = spec["K"], spec["dil"], spec["stride"], spec["pad"]
            # (1) targeted halo zeroing (left pad / right pad rows only) + body.
            pad_ref[:, 0:p, :] = jnp.zeros((B, p, W), jnp.float32)
            pad_ref[:, p + L_in:p + L_in + p, :] = jnp.zeros((B, p, W), jnp.float32)
            pad_ref[:, p:p + L_in, :] = x.reshape(B, L_in, W)
            # (2) K shifted taps concatenated along the lane axis -> single
            #     matmul with K*W-deep contraction (weights pre-packed (K*W, cols)).
            taps = []
            for k in range(K):
                start = k * d
                if s == 1:
                    taps.append(pad_ref[:, start:start + L_out, :])
                else:
                    taps.append(pad_ref[:, pl.ds(start, L_out, stride=s), :])
            xw = jnp.concatenate(taps, axis=-1).reshape(B * L_out, K * W)
            y = mm(xw.astype(jnp.bfloat16), w_ref[...]) + b_ref[...]
            return jnp.maximum(y, 0.0) if spec["relu"] else y

        # ------------------------------ encoder ------------------------------
        x = linear(motion_ref[...].reshape(B * T, F), enc_in_w, enc_in_b)
        for i in range(depth):
            x = conv(x, enc_plan[i], *enc_conv[i])
        x = linear(x, enc_out_w, enc_out_b)                     # (B*Tq, W) f32

        # --------------------- vector quantizer (eval) -----------------------
        # TODO(synk): EMA codebook update / dead-code reset / straight-through
        # gradient are training-only; the eval forward value is this nearest-
        # codebook lookup (distance path kept f32 so the argmin is exact).
        N = B * Tq
        x2 = jnp.sum(x * x, axis=-1, keepdims=True)                    # (N, 1)
        xc = mm(x, cbT_ref[...])                                       # (N, nb_code)
        dist = x2 - 2.0 * xc + cb_sq_ref[...]
        iota = jax.lax.broadcasted_iota(jnp.int32, dist.shape, 1)
        min_d = jnp.min(dist, axis=-1, keepdims=True)
        codes = jnp.min(jnp.where(dist <= min_d, iota, nb_code),
                        axis=-1).astype(jnp.int32)                     # (N,)
        onehot = (iota == codes[:, None]).astype(jnp.float32)          # (N, nb_code)
        xq = mm(onehot, cb_ref[...])                                   # (N, W)
        commit = jnp.mean((x - xq) ** 2)
        prob = jnp.sum(onehot, axis=0) / jnp.float32(N)
        perp = jnp.exp(-jnp.sum(prob * jnp.log(prob + 1e-7)))

        codes_ref[...] = codes.reshape(1, N)
        loss_ref[...] = commit.reshape(1, 1)
        perp_ref[...] = perp.reshape(1, 1)

        # ------------------------------ decoder ------------------------------
        y = linear(xq, dec_in_w, dec_in_b)
        for i in range(depth):
            y = conv(y, dec_plan[i], *dec_conv[i])
        # Last conv is the phase-decomposed ConvTranspose fused with the output
        # projection: lanes [q*128, (q+1)*128) of row m hold output time
        # step m*stride_t + q.  Fully lane-dense store; wrapper de-interleaves.
        recon_ref[...] = y.reshape(B, Td, out_cols)

    return kernel


# -----------------------------------------------------------------------------
# Wrapper: one-time weight repack / fusion + single pallas_call
# -----------------------------------------------------------------------------
_VMEM = pl.BlockSpec(memory_space=pltpu.MemorySpace.VMEM)
_OUT_LANES = 128


def myoskeleton_vqvae_forward(motion, params, *, nfeats, width, depth,
                              stride_t, dilation_growth_rate, nb_code):
    B, T, F = motion.shape
    assert F == nfeats and nfeats <= _OUT_LANES
    assert stride_t % 2 == 0, "phase-decomposed ConvTranspose assumes even stride"

    enc_plan, dec_plan, Tq, T_out = _build_plan(T, depth, stride_t,
                                                dilation_growth_rate)
    Td = dec_plan[-1]["L_out"]
    out_cols = stride_t * _OUT_LANES
    lp_max = max(s["L_in"] + 2 * s["pad"] for s in enc_plan + dec_plan)
    lp_max = ((lp_max + 7) // 8) * 8

    bf16, f32 = jnp.bfloat16, jnp.float32

    def pack_conv(w):        # torch Conv1d (Cout, Cin, K) -> (K*Cin, Cout) bf16
        K, cin, cout = w.shape[2], w.shape[1], w.shape[0]
        return jnp.transpose(w, (2, 1, 0)).reshape(K * cin, cout).astype(bf16)

    def bias(b):
        return b.reshape(1, -1).astype(f32)

    def fuse_convT_and_proj(wt, bt, P, pb):
        """Phase-decompose ConvTranspose1d(W, W, K=2s, stride=s, pad=s//2) and
        fold the output projection: one (3*W, s*128) weight + (1, s*128) bias.
        Phase q of output row m lands in lanes [q*128, (q+1)*128)."""
        Wd, s, pt = wt.shape[0], stride_t, stride_t // 2
        P = P.astype(f32)
        Pp = jnp.zeros((Wd, _OUT_LANES), f32).at[:, :nfeats].set(P)
        b_lane = jnp.zeros((_OUT_LANES,), f32).at[:nfeats].set(
            bt.astype(f32) @ P + pb.astype(f32))
        blocks = []
        for q in range(s):
            k0 = (q + pt) % s
            delta = (q + pt) // s
            Wq = jnp.zeros((3 * Wd, Wd), f32)
            Wq = Wq.at[delta * Wd:(delta + 1) * Wd, :].set(wt[:, :, k0 + s].astype(f32))
            Wq = Wq.at[(delta + 1) * Wd:(delta + 2) * Wd, :].set(wt[:, :, k0].astype(f32))
            blocks.append(Wq @ Pp)                            # (3W, 128)
        w_fused = jnp.concatenate(blocks, axis=1).astype(bf16)   # (3W, s*128)
        b_fused = jnp.tile(b_lane, (s,)).reshape(1, -1).astype(f32)
        return w_fused, b_fused

    cb = params["codebook"].astype(f32)
    inputs = [motion.astype(f32),
              params["enc_in_w"].astype(bf16), bias(params["enc_in_b"])]
    for i in range(depth):
        inputs += [pack_conv(params[f"enc_conv{i}_w"]),
                   bias(params[f"enc_conv{i}_b"])]
    inputs += [params["enc_out_w"].astype(bf16), bias(params["enc_out_b"]),
               cb.T, cb, jnp.sum(cb * cb, axis=1).reshape(1, -1),
               params["dec_in_w"].astype(bf16), bias(params["dec_in_b"])]
    for i in range(depth - 1):
        inputs += [pack_conv(params[f"dec_conv{i}_w"]),
                   bias(params[f"dec_conv{i}_b"])]
    inputs += list(fuse_convT_and_proj(params["dec_convT_w"], params["dec_convT_b"],
                                       params["dec_out_w"], params["dec_out_b"]))

    kernel = _make_fused_kernel(B=B, T=T, F=F, W=width, depth=depth,
                                nb_code=nb_code, enc_plan=enc_plan,
                                dec_plan=dec_plan, Tq=Tq, Td=Td,
                                out_cols=out_cols)

    recon_packed, codes, loss, perp = pl.pallas_call(
        kernel,
        out_shape=(
            jax.ShapeDtypeStruct((B, Td, out_cols), f32),
            jax.ShapeDtypeStruct((1, B * Tq), jnp.int32),
            jax.ShapeDtypeStruct((1, 1), f32),
            jax.ShapeDtypeStruct((1, 1), f32),
        ),
        in_specs=[_VMEM] * len(inputs),
        out_specs=(_VMEM, _VMEM, _VMEM, _VMEM),
        scratch_shapes=[pltpu.VMEM((B, lp_max, width), f32)],
    )(*inputs)

    # De-interleave the stride_t output phases (free XLA reshape) and drop the
    # 128-lane padding back to nfeats.
    recon = recon_packed.reshape(B, Td, stride_t, _OUT_LANES)
    recon = recon.reshape(B, Td * stride_t, _OUT_LANES)[:, :, :nfeats]
    assert recon.shape[1] == T_out
    return recon, loss[0, 0], perp[0, 0], codes.reshape(B, Tq)


# -----------------------------------------------------------------------------
# Parameter init (torch-layout weights; repacked/fused once by the wrapper)
# -----------------------------------------------------------------------------
def init_params(key, *, nfeats, width, depth, stride_t, nb_code):
    def nrm(k, shape, scale=0.02):
        return scale * jax.random.normal(k, shape, jnp.float32)

    keys = iter(jax.random.split(key, 64))
    p = {}
    # Encoder
    p["enc_in_w"] = nrm(next(keys), (nfeats, width))                 # (in, out)
    p["enc_in_b"] = nrm(next(keys), (width,), 0.01)
    for i in range(depth):
        p[f"enc_conv{i}_w"] = nrm(next(keys), (width, width, 3))     # (Cout,Cin,K)
        p[f"enc_conv{i}_b"] = nrm(next(keys), (width,), 0.01)
    p["enc_out_w"] = nrm(next(keys), (width, width))
    p["enc_out_b"] = nrm(next(keys), (width,), 0.01)
    # Quantizer codebook
    p["codebook"] = nrm(next(keys), (nb_code, width), 0.1)
    # Decoder
    p["dec_in_w"] = nrm(next(keys), (width, width))
    p["dec_in_b"] = nrm(next(keys), (width,), 0.01)
    for i in range(depth - 1):
        p[f"dec_conv{i}_w"] = nrm(next(keys), (width, width, 3))     # (Cout,Cin,K)
        p[f"dec_conv{i}_b"] = nrm(next(keys), (width,), 0.01)
    p["dec_convT_w"] = nrm(next(keys), (width, width, stride_t * 2))  # (Cin,Cout,K)
    p["dec_convT_b"] = nrm(next(keys), (width,), 0.01)
    p["dec_out_w"] = nrm(next(keys), (width, nfeats))
    p["dec_out_b"] = nrm(next(keys), (nfeats,), 0.01)
    return p


# -----------------------------------------------------------------------------
if __name__ == "__main__":
    B, T = 2, 16
    NFEATS = 12
    WIDTH = 32
    DEPTH = 3
    STRIDE_T = 2
    DIL_RATE = 3
    NB_CODE = 64

    key = jax.random.PRNGKey(0)
    k_motion, k_params = jax.random.split(key)
    motion = jax.random.normal(k_motion, (B, T, NFEATS), jnp.float32)
    params = init_params(k_params, nfeats=NFEATS, width=WIDTH, depth=DEPTH,
                         stride_t=STRIDE_T, nb_code=NB_CODE)

    fwd = functools.partial(myoskeleton_vqvae_forward,
                            nfeats=NFEATS, width=WIDTH, depth=DEPTH,
                            stride_t=STRIDE_T, dilation_growth_rate=DIL_RATE,
                            nb_code=NB_CODE)

    recon, commit_loss, perplexity, codes = jax.jit(lambda m: fwd(m, params))(motion)
    jax.block_until_ready((recon, commit_loss, perplexity, codes))

    assert recon.shape == (B, T, NFEATS), recon.shape
    assert codes.shape == (B, T // STRIDE_T), codes.shape
    assert commit_loss.shape == () and perplexity.shape == ()
    print("KERNEL_OK")
</pallas_src>

<mosaic_0001>
module attributes {stable_mosaic.version = 11 : i64} {
  func.func @kernel(%arg0: memref<2x16x12xf32, #tpu.memory_space<vmem>>, %arg1: memref<12x32xbf16, #tpu.memory_space<vmem>>, %arg2: memref<1x32xf32, #tpu.memory_space<vmem>>, %arg3: memref<96x32xbf16, #tpu.memory_space<vmem>>, %arg4: memref<1x32xf32, #tpu.memory_space<vmem>>, %arg5: memref<96x32xbf16, #tpu.memory_space<vmem>>, %arg6: memref<1x32xf32, #tpu.memory_space<vmem>>, %arg7: memref<96x32xbf16, #tpu.memory_space<vmem>>, %arg8: memref<1x32xf32, #tpu.memory_space<vmem>>, %arg9: memref<32x32xbf16, #tpu.memory_space<vmem>>, %arg10: memref<1x32xf32, #tpu.memory_space<vmem>>, %arg11: memref<32x64xf32, #tpu.memory_space<vmem>>, %arg12: memref<64x32xf32, #tpu.memory_space<vmem>>, %arg13: memref<1x64xf32, #tpu.memory_space<vmem>>, %arg14: memref<32x32xbf16, #tpu.memory_space<vmem>>, %arg15: memref<1x32xf32, #tpu.memory_space<vmem>>, %arg16: memref<96x32xbf16, #tpu.memory_space<vmem>>, %arg17: memref<1x32xf32, #tpu.memory_space<vmem>>, %arg18: memref<96x32xbf16, #tpu.memory_space<vmem>>, %arg19: memref<1x32xf32, #tpu.memory_space<vmem>>, %arg20: memref<96x256xbf16, #tpu.memory_space<vmem>>, %arg21: memref<1x256xf32, #tpu.memory_space<vmem>>, %arg22: memref<2x8x256xf32, #tpu.memory_space<vmem>>, %arg23: memref<1x16xi32, #tpu.memory_space<vmem>>, %arg24: memref<1x1xf32, #tpu.memory_space<vmem>>, %arg25: memref<1x1xf32, #tpu.memory_space<vmem>>, %arg26: memref<2x32x32xf32, #tpu.memory_space<vmem>>) attributes {dimension_semantics = [], scalar_prefetch = 0 : i64, scratch_operands = 1 : i64, tpu.core_type = #tpu.core_type<tc>} {
    %c0 = arith.constant 0 : index
    %c0_0 = arith.constant 0 : index
    %c0_1 = arith.constant 0 : index
    %0 = vector.load %arg0[%c0, %c0_0, %c0_1] : memref<2x16x12xf32, #tpu.memory_space<vmem>>, vector<2x16x12xf32>
    %1 = vector.shape_cast %0 : vector<2x16x12xf32> to vector<32x12xf32>
    %2 = arith.truncf %1 : vector<32x12xf32> to vector<32x12xbf16>
    %c0_2 = arith.constant 0 : index
    %c0_3 = arith.constant 0 : index
    %3 = vector.load %arg1[%c0_2, %c0_3] : memref<12x32xbf16, #tpu.memory_space<vmem>>, vector<12x32xbf16>
    %cst = arith.constant dense<0.000000e+00> : vector<32x32xf32>
    %4 = tpu.matmul %2, %3, %cst {dimension_numbers = #tpu.dot_dimension_numbers<[1], [0], [0], [1], [0, 0, 1, 1], [], []>} : vector<32x12xbf16>, vector<12x32xbf16>, vector<32x32xf32> -> vector<32x32xf32>
    %c0_4 = arith.constant 0 : index
    %c0_5 = arith.constant 0 : index
    %5 = vector.load %arg2[%c0_4, %c0_5] : memref<1x32xf32, #tpu.memory_space<vmem>>, vector<1x32xf32>
    %6 = vector.broadcast %5 : vector<1x32xf32> to vector<32x32xf32>
    %7 = arith.addf %4, %6 : vector<32x32xf32>
    %cst_6 = arith.constant 0.000000e+00 : f32
    %8 = vector.broadcast %cst_6 : f32 to vector<2x1x32xf32>
    %c0_7 = arith.constant 0 : index
    %c0_8 = arith.constant 0 : index
    %c0_9 = arith.constant 0 : index
    %9 = vector.load %arg26[%c0_7, %c0_8, %c0_9] : memref<2x32x32xf32, #tpu.memory_space<vmem>>, vector<2x1x32xf32>
    tpu.vector_store %arg26[%c0_7, %c0_8, %c0_9], %8 {strides = array<i32>} : memref<2x32x32xf32, #tpu.memory_space<vmem>>, vector<2x1x32xf32>,
    %cst_10 = arith.constant 0.000000e+00 : f32
    %10 = vector.broadcast %cst_10 : f32 to vector<2x1x32xf32>
    %c0_11 = arith.constant 0 : index
    %c17 = arith.constant 17 : index
    %c0_12 = arith.constant 0 : index
    %11 = vector.load %arg26[%c0_11, %c17, %c0_12] : memref<2x32x32xf32, #tpu.memory_space<vmem>>, vector<2x1x32xf32>
    tpu.vector_store %arg26[%c0_11, %c17, %c0_12], %10 {strides = array<i32>} : memref<2x32x32xf32, #tpu.memory_space<vmem>>, vector<2x1x32xf32>,
    %12 = vector.shape_cast %7 : vector<32x32xf32> to vector<2x16x32xf32>
    %c0_13 = arith.constant 0 : index
    %c1 = arith.constant 1 : index
    %c0_14 = arith.constant 0 : index
    %13 = vector.load %arg26[%c0_13, %c1, %c0_14] : memref<2x32x32xf32, #tpu.memory_space<vmem>>, vector<2x16x32xf32>
    tpu.vector_store %arg26[%c0_13, %c1, %c0_14], %12 {strides = array<i32>} : memref<2x32x32xf32, #tpu.memory_space<vmem>>, vector<2x16x32xf32>,
    %c0_15 = arith.constant 0 : index
    %c0_16 = arith.constant 0 : index
    %c0_17 = arith.constant 0 : index
    %14 = tpu.strided_load %arg26[%c0_15, %c0_16, %c0_17] {strides = array<i32: 1, 2, 1>} : memref<2x32x32xf32, #tpu.memory_space<vmem>>, vector<2x8x32xf32>
    %c0_18 = arith.constant 0 : index
    %c1_19 = arith.constant 1 : index
    %c0_20 = arith.constant 0 : index
    %15 = tpu.strided_load %arg26[%c0_18, %c1_19, %c0_20] {strides = array<i32: 1, 2, 1>} : memref<2x32x32xf32, #tpu.memory_space<vmem>>, vector<2x8x32xf32>
    %c0_21 = arith.constant 0 : index
    %c2 = arith.constant 2 : index
    %c0_22 = arith.constant 0 : index
    %16 = tpu.strided_load %arg26[%c0_21, %c2, %c0_22] {strides = array<i32: 1, 2, 1>} : memref<2x32x32xf32, #tpu.memory_space<vmem>>, vector<2x8x32xf32>
    %17 = tpu.concatenate %14, %15, %16 in 2 : vector<2x8x32xf32>, vector<2x8x32xf32>, vector<2x8x32xf32> -> vector<2x8x96xf32>
    %18 = vector.shape_cast %17 : vector<2x8x96xf32> to vector<16x96xf32>
    %19 = arith.truncf %18 : vector<16x96xf32> to vector<16x96xbf16>
    %c0_23 = arith.constant 0 : index
    %c0_24 = arith.constant 0 : index
    %20 = vector.load %arg3[%c0_23, %c0_24] : memref<96x32xbf16, #tpu.memory_space<vmem>>, vector<96x32xbf16>
    %cst_25 = arith.constant dense<0.000000e+00> : vector<16x32xf32>
    %21 = tpu.matmul %19, %20, %cst_25 {dimension_numbers = #tpu.dot_dimension_numbers<[1], [0], [0], [1], [0, 0, 1, 1], [], []>} : vector<16x96xbf16>, vector<96x32xbf16>, vector<16x32xf32> -> vector<16x32xf32>
    %c0_26 = arith.constant 0 : index
    %c0_27 = arith.constant 0 : index
    %22 = vector.load %arg4[%c0_26, %c0_27] : memref<1x32xf32, #tpu.memory_space<vmem>>, vector<1x32xf32>
    %23 = vector.broadcast %22 : vector<1x32xf32> to vector<16x32xf32>
    %24 = arith.addf %21, %23 : vector<16x32xf32>
    %cst_28 = arith.constant 0.000000e+00 : f32
    %25 = vector.broadcast %cst_28 : f32 to vector<16x32xf32>
    %26 = arith.maximumf %24, %25 : vector<16x32xf32>
    %cst_29 = arith.constant 0.000000e+00 : f32
    %27 = vector.broadcast %cst_29 : f32 to vector<2x3x32xf32>
    %c0_30 = arith.constant 0 : index
    %c0_31 = arith.constant 0 : index
    %c0_32 = arith.constant 0 : index
    %28 = vector.load %arg26[%c0_30, %c0_31, %c0_32] : memref<2x32x32xf32, #tpu.memory_space<vmem>>, vector<2x3x32xf32>
    tpu.vector_store %arg26[%c0_30, %c0_31, %c0_32], %27 {strides = array<i32>} : memref<2x32x32xf32, #tpu.memory_space<vmem>>, vector<2x3x32xf32>,
    %cst_33 = arith.constant 0.000000e+00 : f32
    %29 = vector.broadcast %cst_33 : f32 to vector<2x3x32xf32>
    %c0_34 = arith.constant 0 : index
    %c11 = arith.constant 11 : index
    %c0_35 = arith.constant 0 : index
    %30 = vector.load %arg26[%c0_34, %c11, %c0_35] : memref<2x32x32xf32, #tpu.memory_space<vmem>>, vector<2x3x32xf32>
    tpu.vector_store %arg26[%c0_34, %c11, %c0_35], %29 {strides = array<i32>} : memref<2x32x32xf32, #tpu.memory_space<vmem>>, vector<2x3x32xf32>,
    %31 = vector.shape_cast %26 : vector<16x32xf32> to vector<2x8x32xf32>
    %c0_36 = arith.constant 0 : index
    %c3 = arith.constant 3 : index
    %c0_37 = arith.constant 0 : index
    %32 = vector.load %arg26[%c0_36, %c3, %c0_37] : memref<2x32x32xf32, #tpu.memory_space<vmem>>, vector<2x8x32xf32>
    tpu.vector_store %arg26[%c0_36, %c3, %c0_37], %31 {strides = array<i32>} : memref<2x32x32xf32, #tpu.memory_space<vmem>>, vector<2x8x32xf32>,
    %c0_38 = arith.constant 0 : index
    %c0_39 = arith.constant 0 : index
    %c0_40 = arith.constant 0 : index
    %33 = vector.load %arg26[%c0_38, %c0_39, %c0_40] : memref<2x32x32xf32, #tpu.memory_space<vmem>>, vector<2x8x32xf32>
    %c0_41 = arith.constant 0 : index
    %c3_42 = arith.constant 3 : index
    %c0_43 = arith.constant 0 : index
    %34 = vector.load %arg26[%c0_41, %c3_42, %c0_43] : memref<2x32x32xf32, #tpu.memory_space<vmem>>, vector<2x8x32xf32>
    %c0_44 = arith.constant 0 : index
    %c6 = arith.constant 6 : index
    %c0_45 = arith.constant 0 : index
    %35 = vector.load %arg26[%c0_44, %c6, %c0_45] : memref<2x32x32xf32, #tpu.memory_space<vmem>>, vector<2x8x32xf32>
    %36 = tpu.concatenate %33, %34, %35 in 2 : vector<2x8x32xf32>, vector<2x8x32xf32>, vector<2x8x32xf32> -> vector<2x8x96xf32>
    %37 = vector.shape_cast %36 : vector<2x8x96xf32> to vector<16x96xf32>
    %38 = arith.truncf %37 : vector<16x96xf32> to vector<16x96xbf16>
    %c0_46 = arith.constant 0 : index
    %c0_47 = arith.constant 0 : index
    %39 = vector.load %arg5[%c0_46, %c0_47] : memref<96x32xbf16, #tpu.memory_space<vmem>>, vector<96x32xbf16>
    %cst_48 = arith.constant dense<0.000000e+00> : vector<16x32xf32>
    %40 = tpu.matmul %38, %39, %cst_48 {dimension_numbers = #tpu.dot_dimension_numbers<[1], [0], [0], [1], [0, 0, 1, 1], [], []>} : vector<16x96xbf16>, vector<96x32xbf16>, vector<16x32xf32> -> vector<16x32xf32>
    %c0_49 = arith.constant 0 : index
    %c0_50 = arith.constant 0 : index
    %41 = vector.load %arg6[%c0_49, %c0_50] : memref<1x32xf32, #tpu.memory_space<vmem>>, vector<1x32xf32>
    %42 = vector.broadcast %41 : vector<1x32xf32> to vector<16x32xf32>
    %43 = arith.addf %40, %42 : vector<16x32xf32>
    %cst_51 = arith.constant 0.000000e+00 : f32
    %44 = vector.broadcast %cst_51 : f32 to vector<16x32xf32>
    %45 = arith.maximumf %43, %44 : vector<16x32xf32>
    %cst_52 = arith.constant 0.000000e+00 : f32
    %46 = vector.broadcast %cst_52 : f32 to vector<2x9x32xf32>
    %c0_53 = arith.constant 0 : index
    %c0_54 = arith.constant 0 : index
    %c0_55 = arith.constant 0 : index
    %47 = vector.load %arg26[%c0_53, %c0_54, %c0_55] : memref<2x32x32xf32, #tpu.memory_space<vmem>>, vector<2x9x32xf32>
    tpu.vector_store %arg26[%c0_53, %c0_54, %c0_55], %46 {strides = array<i32>} : memref<2x32x32xf32, #tpu.memory_space<vmem>>, vector<2x9x32xf32>,
    %cst_56 = arith.constant 0.000000e+00 : f32
    %48 = vector.broadcast %cst_56 : f32 to vector<2x9x32xf32>
    %c0_57 = arith.constant 0 : index
    %c17_58 = arith.constant 17 : index
    %c0_59 = arith.constant 0 : index
    %49 = vector.load %arg26[%c0_57, %c17_58, %c0_59] : memref<2x32x32xf32, #tpu.memory_space<vmem>>, vector<2x9x32xf32>
    tpu.vector_store %arg26[%c0_57, %c17_58, %c0_59], %48 {strides = array<i32>} : memref<2x32x32xf32, #tpu.memory_space<vmem>>, vector<2x9x32xf32>,
    %50 = vector.shape_cast %45 : vector<16x32xf32> to vector<2x8x32xf32>
    %c0_60 = arith.constant 0 : index
    %c9 = arith.constant 9 : index
    %c0_61 = arith.constant 0 : index
    %51 = vector.load %arg26[%c0_60, %c9, %c0_61] : memref<2x32x32xf32, #tpu.memory_space<vmem>>, vector<2x8x32xf32>
    tpu.vector_store %arg26[%c0_60, %c9, %c0_61], %50 {strides = array<i32>} : memref<2x32x32xf32, #tpu.memory_space<vmem>>, vector<2x8x32xf32>,
    %c0_62 = arith.constant 0 : index
    %c0_63 = arith.constant 0 : index
    %c0_64 = arith.constant 0 : index
    %52 = vector.load %arg26[%c0_62, %c0_63, %c0_64] : memref<2x32x32xf32, #tpu.memory_space<vmem>>, vector<2x8x32xf32>
    %c0_65 = arith.constant 0 : index
    %c9_66 = arith.constant 9 : index
    %c0_67 = arith.constant 0 : index
    %53 = vector.load %arg26[%c0_65, %c9_66, %c0_67] : memref<2x32x32xf32, #tpu.memory_space<vmem>>, vector<2x8x32xf32>
    %c0_68 = arith.constant 0 : index
    %c18 = arith.constant 18 : index
    %c0_69 = arith.constant 0 : index
    %54 = vector.load %arg26[%c0_68, %c18, %c0_69] : memref<2x32x32xf32, #tpu.memory_space<vmem>>, vector<2x8x32xf32>
    %55 = tpu.concatenate %52, %53, %54 in 2 : vector<2x8x32xf32>, vector<2x8x32xf32>, vector<2x8x32xf32> -> vector<2x8x96xf32>
    %56 = vector.shape_cast %55 : vector<2x8x96xf32> to vector<16x96xf32>
    %57 = arith.truncf %56 : vector<16x96xf32> to vector<16x96xbf16>
    %c0_70 = arith.constant 0 : index
    %c0_71 = arith.constant 0 : index
    %58 = vector.load %arg7[%c0_70, %c0_71] : memref<96x32xbf16, #tpu.memory_space<vmem>>, vector<96x32xbf16>
    %cst_72 = arith.constant dense<0.000000e+00> : vector<16x32xf32>
    %59 = tpu.matmul %57, %58, %cst_72 {dimension_numbers = #tpu.dot_dimension_numbers<[1], [0], [0], [1], [0, 0, 1, 1], [], []>} : vector<16x96xbf16>, vector<96x32xbf16>, vector<16x32xf32> -> vector<16x32xf32>
    %c0_73 = arith.constant 0 : index
    %c0_74 = arith.constant 0 : index
    %60 = vector.load %arg8[%c0_73, %c0_74] : memref<1x32xf32, #tpu.memory_space<vmem>>, vector<1x32xf32>
    %61 = vector.broadcast %60 : vector<1x32xf32> to vector<16x32xf32>
    %62 = arith.addf %59, %61 : vector<16x32xf32>
    %cst_75 = arith.constant 0.000000e+00 : f32
    %63 = vector.broadcast %cst_75 : f32 to vector<16x32xf32>
    %64 = arith.maximumf %62, %63 : vector<16x32xf32>
    %65 = arith.truncf %64 : vector<16x32xf32> to vector<16x32xbf16>
    %c0_76 = arith.constant 0 : index
    %c0_77 = arith.constant 0 : index
    %66 = vector.load %arg9[%c0_76, %c0_77] : memref<32x32xbf16, #tpu.memory_space<vmem>>, vector<32x32xbf16>
    %cst_78 = arith.constant dense<0.000000e+00> : vector<16x32xf32>
    %67 = tpu.matmul %65, %66, %cst_78 {dimension_numbers = #tpu.dot_dimension_numbers<[1], [0], [0], [1], [0, 0, 1, 1], [], []>} : vector<16x32xbf16>, vector<32x32xbf16>, vector<16x32xf32> -> vector<16x32xf32>
    %c0_79 = arith.constant 0 : index
    %c0_80 = arith.constant 0 : index
    %68 = vector.load %arg10[%c0_79, %c0_80] : memref<1x32xf32, #tpu.memory_space<vmem>>, vector<1x32xf32>
    %69 = vector.broadcast %68 : vector<1x32xf32> to vector<16x32xf32>
    %70 = arith.addf %67, %69 : vector<16x32xf32>
    %71 = arith.mulf %70, %70 : vector<16x32xf32>
    %cst_81 = arith.constant dense<0.000000e+00> : vector<16xf32>
    %72 = vector.multi_reduction <add>, %71, %cst_81 [1] : vector<16x32xf32> to vector<16xf32>
    %73 = vector.shape_cast %72 : vector<16xf32> to vector<16x1xf32>
    %c0_82 = arith.constant 0 : index
    %c0_83 = arith.constant 0 : index
    %74 = vector.load %arg11[%c0_82, %c0_83] : memref<32x64xf32, #tpu.memory_space<vmem>>, vector<32x64xf32>
    %cst_84 = arith.constant dense<0.000000e+00> : vector<16x64xf32>
    %75 = tpu.matmul %70, %74, %cst_84 {dimension_numbers = #tpu.dot_dimension_numbers<[1], [0], [0], [1], [0, 0, 1, 1], [], []>} : vector<16x32xf32>, vector<32x64xf32>, vector<16x64xf32> -> vector<16x64xf32>
    %cst_85 = arith.constant 2.000000e+00 : f32
    %76 = vector.broadcast %cst_85 : f32 to vector<16x64xf32>
    %77 = arith.mulf %76, %75 : vector<16x64xf32>
    %78 = vector.broadcast %73 : vector<16x1xf32> to vector<16x64xf32>
    %79 = arith.subf %78, %77 : vector<16x64xf32>
    %c0_86 = arith.constant 0 : index
    %c0_87 = arith.constant 0 : index
    %80 = vector.load %arg13[%c0_86, %c0_87] : memref<1x64xf32, #tpu.memory_space<vmem>>, vector<1x64xf32>
    %81 = vector.broadcast %80 : vector<1x64xf32> to vector<16x64xf32>
    %82 = arith.addf %79, %81 : vector<16x64xf32>
    %83 = tpu.iota {dimensions = array<i32: 1>} : vector<16x64xi32>
    %cst_88 = arith.constant dense<0x7F800000> : vector<16xf32>
    %84 = vector.multi_reduction <minimumf>, %82, %cst_88 [1] : vector<16x64xf32> to vector<16xf32>
    %85 = vector.shape_cast %84 : vector<16xf32> to vector<16x1xf32>
    %86 = vector.broadcast %85 : vector<16x1xf32> to vector<16x64xf32>
    %87 = arith.cmpf ole, %82, %86 : vector<16x64xf32>
    %c64_i32 = arith.constant 64 : i32
    %88 = vector.broadcast %c64_i32 : i32 to vector<16x64xi32>
    %89 = arith.select %87, %83, %88 : vector<16x64xi1>, vector<16x64xi32>
    %cst_89 = arith.constant dense<2147483647> : vector<16xi32>
    %90 = vector.multi_reduction <minsi>, %89, %cst_89 [1] : vector<16x64xi32> to vector<16xi32>
    %91 = vector.shape_cast %90 : vector<16xi32> to vector<16x1xi32>
    %92 = vector.broadcast %91 : vector<16x1xi32> to vector<16x64xi32>
    %93 = arith.cmpi eq, %83, %92 : vector<16x64xi32>
    %94 = arith.extui %93 : vector<16x64xi1> to vector<16x64xi32>
    %95 = arith.sitofp %94 : vector<16x64xi32> to vector<16x64xf32>
    %c0_90 = arith.constant 0 : index
    %c0_91 = arith.constant 0 : index
    %96 = vector.load %arg12[%c0_90, %c0_91] : memref<64x32xf32, #tpu.memory_space<vmem>>, vector<64x32xf32>
    %cst_92 = arith.constant dense<0.000000e+00> : vector<16x32xf32>
    %97 = tpu.matmul %95, %96, %cst_92 {dimension_numbers = #tpu.dot_dimension_numbers<[1], [0], [0], [1], [0, 0, 1, 1], [], []>} : vector<16x64xf32>, vector<64x32xf32>, vector<16x32xf32> -> vector<16x32xf32>
    %98 = arith.subf %70, %97 : vector<16x32xf32>
    %99 = arith.mulf %98, %98 : vector<16x32xf32>
    %100 = vector.shape_cast %99 : vector<16x32xf32> to vector<1x16x32xf32>
    %cst_93 = arith.constant dense<0.000000e+00> : vector<1xf32>
    %101 = vector.multi_reduction <add>, %100, %cst_93 [1, 2] : vector<1x16x32xf32> to vector<1xf32>
    %102 = vector.shape_cast %101 : vector<1xf32> to vector<1x1x1xf32>
    %103 = vector.extract %102[0, 0, 0] : f32 from vector<1x1x1xf32>
    %cst_94 = arith.constant 5.120000e+02 : f32
    %104 = arith.divf %103, %cst_94 : f32
    %cst_95 = arith.constant dense<0.000000e+00> : vector<64xf32>
    %105 = vector.multi_reduction <add>, %95, %cst_95 [0] : vector<16x64xf32> to vector<64xf32>
    %cst_96 = arith.constant 1.600000e+01 : f32
    %106 = vector.broadcast %cst_96 : f32 to vector<64xf32>
    %107 = arith.divf %105, %106 : vector<64xf32>
    %cst_97 = arith.constant 1.000000e-07 : f32
    %108 = vector.broadcast %cst_97 : f32 to vector<64xf32>
    %109 = arith.addf %107, %108 : vector<64xf32>
    %110 = math.log %109 : vector<64xf32>
    %111 = arith.mulf %107, %110 : vector<64xf32>
    %112 = vector.shape_cast %111 : vector<64xf32> to vector<1x64xf32>
    %cst_98 = arith.constant dense<0.000000e+00> : vector<1xf32>
    %113 = vector.multi_reduction <add>, %112, %cst_98 [1] : vector<1x64xf32> to vector<1xf32>
    %114 = vector.shape_cast %113 : vector<1xf32> to vector<1x1xf32>
    %115 = vector.extract %114[0, 0] : f32 from vector<1x1xf32>
    %cst_99 = arith.constant 0.000000e+00 : f32
    %116 = arith.subf %cst_99, %115 : f32
    %117 = math.exp %116 : f32
    %118 = vector.shape_cast %90 : vector<16xi32> to vector<1x16xi32>
    %c0_100 = arith.constant 0 : index
    %c0_101 = arith.constant 0 : index
    %119 = vector.load %arg23[%c0_100, %c0_101] : memref<1x16xi32, #tpu.memory_space<vmem>>, vector<1x16xi32>
    tpu.vector_store %arg23[%c0_100, %c0_101], %118 {strides = array<i32>} : memref<1x16xi32, #tpu.memory_space<vmem>>, vector<1x16xi32>,
    %120 = vector.broadcast %104 : f32 to vector<1x1xf32>
    %c0_102 = arith.constant 0 : index
    %c0_103 = arith.constant 0 : index
    %121 = vector.load %arg24[%c0_102, %c0_103] : memref<1x1xf32, #tpu.memory_space<vmem>>, vector<1x1xf32>
    tpu.vector_store %arg24[%c0_102, %c0_103], %120 {strides = array<i32>} : memref<1x1xf32, #tpu.memory_space<vmem>>, vector<1x1xf32>,
    %122 = vector.broadcast %117 : f32 to vector<1x1xf32>
    %c0_104 = arith.constant 0 : index
    %c0_105 = arith.constant 0 : index
    %123 = vector.load %arg25[%c0_104, %c0_105] : memref<1x1xf32, #tpu.memory_space<vmem>>, vector<1x1xf32>
    tpu.vector_store %arg25[%c0_104, %c0_105], %122 {strides = array<i32>} : memref<1x1xf32, #tpu.memory_space<vmem>>, vector<1x1xf32>,
    %124 = arith.truncf %97 : vector<16x32xf32> to vector<16x32xbf16>
    %c0_106 = arith.constant 0 : index
    %c0_107 = arith.constant 0 : index
    %125 = vector.load %arg14[%c0_106, %c0_107] : memref<32x32xbf16, #tpu.memory_space<vmem>>, vector<32x32xbf16>
    %cst_108 = arith.constant dense<0.000000e+00> : vector<16x32xf32>
    %126 = tpu.matmul %124, %125, %cst_108 {dimension_numbers = #tpu.dot_dimension_numbers<[1], [0], [0], [1], [0, 0, 1, 1], [], []>} : vector<16x32xbf16>, vector<32x32xbf16>, vector<16x32xf32> -> vector<16x32xf32>
    %c0_109 = arith.constant 0 : index
    %c0_110 = arith.constant 0 : index
    %127 = vector.load %arg15[%c0_109, %c0_110] : memref<1x32xf32, #tpu.memory_space<vmem>>, vector<1x32xf32>
    %128 = vector.broadcast %127 : vector<1x32xf32> to vector<16x32xf32>
    %129 = arith.addf %126, %128 : vector<16x32xf32>
    %cst_111 = arith.constant 0.000000e+00 : f32
    %130 = vector.broadcast %cst_111 : f32 to vector<2x9x32xf32>
    %c0_112 = arith.constant 0 : index
    %c0_113 = arith.constant 0 : index
    %c0_114 = arith.constant 0 : index
    %131 = vector.load %arg26[%c0_112, %c0_113, %c0_114] : memref<2x32x32xf32, #tpu.memory_space<vmem>>, vector<2x9x32xf32>
    tpu.vector_store %arg26[%c0_112, %c0_113, %c0_114], %130 {strides = array<i32>} : memref<2x32x32xf32, #tpu.memory_space<vmem>>, vector<2x9x32xf32>,
    %cst_115 = arith.constant 0.000000e+00 : f32
    %132 = vector.broadcast %cst_115 : f32 to vector<2x9x32xf32>
    %c0_116 = arith.constant 0 : index
    %c17_117 = arith.constant 17 : index
    %c0_118 = arith.constant 0 : index
    %133 = vector.load %arg26[%c0_116, %c17_117, %c0_118] : memref<2x32x32xf32, #tpu.memory_space<vmem>>, vector<2x9x32xf32>
    tpu.vector_store %arg26[%c0_116, %c17_117, %c0_118], %132 {strides = array<i32>} : memref<2x32x32xf32, #tpu.memory_space<vmem>>, vector<2x9x32xf32>,
    %134 = vector.shape_cast %129 : vector<16x32xf32> to vector<2x8x32xf32>
    %c0_119 = arith.constant 0 : index
    %c9_120 = arith.constant 9 : index
    %c0_121 = arith.constant 0 : index
    %135 = vector.load %arg26[%c0_119, %c9_120, %c0_121] : memref<2x32x32xf32, #tpu.memory_space<vmem>>, vector<2x8x32xf32>
    tpu.vector_store %arg26[%c0_119, %c9_120, %c0_121], %134 {strides = array<i32>} : memref<2x32x32xf32, #tpu.memory_space<vmem>>, vector<2x8x32xf32>,
    %c0_122 = arith.constant 0 : index
    %c0_123 = arith.constant 0 : index
    %c0_124 = arith.constant 0 : index
    %136 = vector.load %arg26[%c0_122, %c0_123, %c0_124] : memref<2x32x32xf32, #tpu.memory_space<vmem>>, vector<2x8x32xf32>
    %c0_125 = arith.constant 0 : index
    %c9_126 = arith.constant 9 : index
    %c0_127 = arith.constant 0 : index
    %137 = vector.load %arg26[%c0_125, %c9_126, %c0_127] : memref<2x32x32xf32, #tpu.memory_space<vmem>>, vector<2x8x32xf32>
    %c0_128 = arith.constant 0 : index
    %c18_129 = arith.constant 18 : index
    %c0_130 = arith.constant 0 : index
    %138 = vector.load %arg26[%c0_128, %c18_129, %c0_130] : memref<2x32x32xf32, #tpu.memory_space<vmem>>, vector<2x8x32xf32>
    %139 = tpu.concatenate %136, %137, %138 in 2 : vector<2x8x32xf32>, vector<2x8x32xf32>, vector<2x8x32xf32> -> vector<2x8x96xf32>
    %140 = vector.shape_cast %139 : vector<2x8x96xf32> to vector<16x96xf32>
    %141 = arith.truncf %140 : vector<16x96xf32> to vector<16x96xbf16>
    %c0_131 = arith.constant 0 : index
    %c0_132 = arith.constant 0 : index
    %142 = vector.load %arg16[%c0_131, %c0_132] : memref<96x32xbf16, #tpu.memory_space<vmem>>, vector<96x32xbf16>
    %cst_133 = arith.constant dense<0.000000e+00> : vector<16x32xf32>
    %143 = tpu.matmul %141, %142, %cst_133 {dimension_numbers = #tpu.dot_dimension_numbers<[1], [0], [0], [1], [0, 0, 1, 1], [], []>} : vector<16x96xbf16>, vector<96x32xbf16>, vector<16x32xf32> -> vector<16x32xf32>
    %c0_134 = arith.constant 0 : index
    %c0_135 = arith.constant 0 : index
    %144 = vector.load %arg17[%c0_134, %c0_135] : memref<1x32xf32, #tpu.memory_space<vmem>>, vector<1x32xf32>
    %145 = vector.broadcast %144 : vector<1x32xf32> to vector<16x32xf32>
    %146 = arith.addf %143, %145 : vector<16x32xf32>
    %cst_136 = arith.constant 0.000000e+00 : f32
    %147 = vector.broadcast %cst_136 : f32 to vector<16x32xf32>
    %148 = arith.maximumf %146, %147 : vector<16x32xf32>
    %cst_137 = arith.constant 0.000000e+00 : f32
    %149 = vector.broadcast %cst_137 : f32 to vector<2x3x32xf32>
    %c0_138 = arith.constant 0 : index
    %c0_139 = arith.constant 0 : index
    %c0_140 = arith.constant 0 : index
    %150 = vector.load %arg26[%c0_138, %c0_139, %c0_140] : memref<2x32x32xf32, #tpu.memory_space<vmem>>, vector<2x3x32xf32>
    tpu.vector_store %arg26[%c0_138, %c0_139, %c0_140], %149 {strides = array<i32>} : memref<2x32x32xf32, #tpu.memory_space<vmem>>, vector<2x3x32xf32>,
    %cst_141 = arith.constant 0.000000e+00 : f32
    %151 = vector.broadcast %cst_141 : f32 to vector<2x3x32xf32>
    %c0_142 = arith.constant 0 : index
    %c11_143 = arith.constant 11 : index
    %c0_144 = arith.constant 0 : index
    %152 = vector.load %arg26[%c0_142, %c11_143, %c0_144] : memref<2x32x32xf32, #tpu.memory_space<vmem>>, vector<2x3x32xf32>
    tpu.vector_store %arg26[%c0_142, %c11_143, %c0_144], %151 {strides = array<i32>} : memref<2x32x32xf32, #tpu.memory_space<vmem>>, vector<2x3x32xf32>,
    %153 = vector.shape_cast %148 : vector<16x32xf32> to vector<2x8x32xf32>
    %c0_145 = arith.constant 0 : index
    %c3_146 = arith.constant 3 : index
    %c0_147 = arith.constant 0 : index
    %154 = vector.load %arg26[%c0_145, %c3_146, %c0_147] : memref<2x32x32xf32, #tpu.memory_space<vmem>>, vector<2x8x32xf32>
    tpu.vector_store %arg26[%c0_145, %c3_146, %c0_147], %153 {strides = array<i32>} : memref<2x32x32xf32, #tpu.memory_space<vmem>>, vector<2x8x32xf32>,
    %c0_148 = arith.constant 0 : index
    %c0_149 = arith.constant 0 : index
    %c0_150 = arith.constant 0 : index
    %155 = vector.load %arg26[%c0_148, %c0_149, %c0_150] : memref<2x32x32xf32, #tpu.memory_space<vmem>>, vector<2x8x32xf32>
    %c0_151 = arith.constant 0 : index
    %c3_152 = arith.constant 3 : index
    %c0_153 = arith.constant 0 : index
    %156 = vector.load %arg26[%c0_151, %c3_152, %c0_153] : memref<2x32x32xf32, #tpu.memory_space<vmem>>, vector<2x8x32xf32>
    %c0_154 = arith.constant 0 : index
    %c6_155 = arith.constant 6 : index
    %c0_156 = arith.constant 0 : index
    %157 = vector.load %arg26[%c0_154, %c6_155, %c0_156] : memref<2x32x32xf32, #tpu.memory_space<vmem>>, vector<2x8x32xf32>
    %158 = tpu.concatenate %155, %156, %157 in 2 : vector<2x8x32xf32>, vector<2x8x32xf32>, vector<2x8x32xf32> -> vector<2x8x96xf32>
    %159 = vector.shape_cast %158 : vector<2x8x96xf32> to vector<16x96xf32>
    %160 = arith.truncf %159 : vector<16x96xf32> to vector<16x96xbf16>
    %c0_157 = arith.constant 0 : index
    %c0_158 = arith.constant 0 : index
    %161 = vector.load %arg18[%c0_157, %c0_158] : memref<96x32xbf16, #tpu.memory_space<vmem>>, vector<96x32xbf16>
    %cst_159 = arith.constant dense<0.000000e+00> : vector<16x32xf32>
    %162 = tpu.matmul %160, %161, %cst_159 {dimension_numbers = #tpu.dot_dimension_numbers<[1], [0], [0], [1], [0, 0, 1, 1], [], []>} : vector<16x96xbf16>, vector<96x32xbf16>, vector<16x32xf32> -> vector<16x32xf32>
    %c0_160 = arith.constant 0 : index
    %c0_161 = arith.constant 0 : index
    %163 = vector.load %arg19[%c0_160, %c0_161] : memref<1x32xf32, #tpu.memory_space<vmem>>, vector<1x32xf32>
    %164 = vector.broadcast %163 : vector<1x32xf32> to vector<16x32xf32>
    %165 = arith.addf %162, %164 : vector<16x32xf32>
    %cst_162 = arith.constant 0.000000e+00 : f32
    %166 = vector.broadcast %cst_162 : f32 to vector<16x32xf32>
    %167 = arith.maximumf %165, %166 : vector<16x32xf32>
    %cst_163 = arith.constant 0.000000e+00 : f32
    %168 = vector.broadcast %cst_163 : f32 to vector<2x1x32xf32>
    %c0_164 = arith.constant 0 : index
    %c0_165 = arith.constant 0 : index
    %c0_166 = arith.constant 0 : index
    %169 = vector.load %arg26[%c0_164, %c0_165, %c0_166] : memref<2x32x32xf32, #tpu.memory_space<vmem>>, vector<2x1x32xf32>
    tpu.vector_store %arg26[%c0_164, %c0_165, %c0_166], %168 {strides = array<i32>} : memref<2x32x32xf32, #tpu.memory_space<vmem>>, vector<2x1x32xf32>,
    %cst_167 = arith.constant 0.000000e+00 : f32
    %170 = vector.broadcast %cst_167 : f32 to vector<2x1x32xf32>
    %c0_168 = arith.constant 0 : index
    %c9_169 = arith.constant 9 : index
    %c0_170 = arith.constant 0 : index
    %171 = vector.load %arg26[%c0_168, %c9_169, %c0_170] : memref<2x32x32xf32, #tpu.memory_space<vmem>>, vector<2x1x32xf32>
    tpu.vector_store %arg26[%c0_168, %c9_169, %c0_170], %170 {strides = array<i32>} : memref<2x32x32xf32, #tpu.memory_space<vmem>>, vector<2x1x32xf32>,
    %172 = vector.shape_cast %167 : vector<16x32xf32> to vector<2x8x32xf32>
    %c0_171 = arith.constant 0 : index
    %c1_172 = arith.constant 1 : index
    %c0_173 = arith.constant 0 : index
    %173 = vector.load %arg26[%c0_171, %c1_172, %c0_173] : memref<2x32x32xf32, #tpu.memory_space<vmem>>, vector<2x8x32xf32>
    tpu.vector_store %arg26[%c0_171, %c1_172, %c0_173], %172 {strides = array<i32>} : memref<2x32x32xf32, #tpu.memory_space<vmem>>, vector<2x8x32xf32>,
    %c0_174 = arith.constant 0 : index
    %c0_175 = arith.constant 0 : index
    %c0_176 = arith.constant 0 : index
    %174 = vector.load %arg26[%c0_174, %c0_175, %c0_176] : memref<2x32x32xf32, #tpu.memory_space<vmem>>, vector<2x8x32xf32>
    %c0_177 = arith.constant 0 : index
    %c1_178 = arith.constant 1 : index
    %c0_179 = arith.constant 0 : index
    %175 = vector.load %arg26[%c0_177, %c1_178, %c0_179] : memref<2x32x32xf32, #tpu.memory_space<vmem>>, vector<2x8x32xf32>
    %c0_180 = arith.constant 0 : index
    %c2_181 = arith.constant 2 : index
    %c0_182 = arith.constant 0 : index
    %176 = vector.load %arg26[%c0_180, %c2_181, %c0_182] : memref<2x32x32xf32, #tpu.memory_space<vmem>>, vector<2x8x32xf32>
    %177 = tpu.concatenate %174, %175, %176 in 2 : vector<2x8x32xf32>, vector<2x8x32xf32>, vector<2x8x32xf32> -> vector<2x8x96xf32>
    %178 = vector.shape_cast %177 : vector<2x8x96xf32> to vector<16x96xf32>
    %179 = arith.truncf %178 : vector<16x96xf32> to vector<16x96xbf16>
    %c0_183 = arith.constant 0 : index
    %c0_184 = arith.constant 0 : index
    %180 = vector.load %arg20[%c0_183, %c0_184] : memref<96x256xbf16, #tpu.memory_space<vmem>>, vector<96x256xbf16>
    %cst_185 = arith.constant dense<0.000000e+00> : vector<16x256xf32>
    %181 = tpu.matmul %179, %180, %cst_185 {dimension_numbers = #tpu.dot_dimension_numbers<[1], [0], [0], [1], [0, 0, 1, 1], [], []>} : vector<16x96xbf16>, vector<96x256xbf16>, vector<16x256xf32> -> vector<16x256xf32>
    %c0_186 = arith.constant 0 : index
    %c0_187 = arith.constant 0 : index
    %182 = vector.load %arg21[%c0_186, %c0_187] : memref<1x256xf32, #tpu.memory_space<vmem>>, vector<1x256xf32>
    %183 = vector.broadcast %182 : vector<1x256xf32> to vector<16x256xf32>
    %184 = arith.addf %181, %183 : vector<16x256xf32>
    %185 = vector.shape_cast %184 : vector<16x256xf32> to vector<2x8x256xf32>
    %c0_188 = arith.constant 0 : index
    %c0_189 = arith.constant 0 : index
    %c0_190 = arith.constant 0 : index
    %186 = vector.load %arg22[%c0_188, %c0_189, %c0_190] : memref<2x8x256xf32, #tpu.memory_space<vmem>>, vector<2x8x256xf32>
    tpu.vector_store %arg22[%c0_188, %c0_189, %c0_190], %185 {strides = array<i32>} : memref<2x8x256xf32, #tpu.memory_space<vmem>>, vector<2x8x256xf32>,
    return
  }
}

</mosaic_0001>

<bundles_post_ra>
// kernel: tile.8
= control target key start
LH: loop header
LB: loop body
LE: loop exit
PB: predicated region body
PF: predicated region fallthrough
CT: control target
= control target key end

     0   :  { %s22_s0 = inlined_call_operand.vmem [shape: f32[128], index: 0, kind: input, shape index: {}]   ;;  %s23_s1 = inlined_call_operand.vmem [shape: f32[2,128], index: 1, kind: output, shape index: {}]  }
   0x1   :  { %v4_v0 = vld [vmem:[%s22_s0] ss:$0 sm:$0xff] }
   0x2   :  { %5 = vst [vmem:[%s23_s1] sm:$0x3] %v4_v0 }

// kernel: _lambda_.1
= control target key start
LH: loop header
LB: loop body
LE: loop exit
PB: predicated region body
PF: predicated region fallthrough
CT: control target
= control target key end

     0   :  { %s2571_s0 = inlined_call_operand.vmem [shape: f32[2,16,12], index: 0, kind: input, shape index: {}]   ;;  %s2572_s1 = inlined_call_operand.vmem [shape: bf16[12,32], index: 1, kind: input, shape index: {}]   ;;  %s2573_s2 = inlined_call_operand.vmem [shape: f32[1,32], index: 2, kind: input, shape index: {}]   ;;  %s2574_s3 = inlined_call_operand.vmem [shape: bf16[96,32], index: 3, kind: input, shape index: {}]   ;;  %s2575_s4 = inlined_call_operand.vmem [shape: f32[1,32], index: 4, kind: input, shape index: {}]   ;;  %s2576_s5 = inlined_call_operand.vmem [shape: bf16[96,32], index: 5, kind: input, shape index: {}]   ;;  %s2577_s6 = inlined_call_operand.vmem [shape: f32[1,32], index: 6, kind: input, shape index: {}]   ;;  %s2578_s7 = inlined_call_operand.vmem [shape: bf16[96,32], index: 7, kind: input, shape index: {}]   ;;  %s2579_s8 = inlined_call_operand.vmem [shape: f32[1,32], index: 8, kind: input, shape index: {}]   ;;  %s2580_s9 = inlined_call_operand.vmem [shape: bf16[32,32], index: 9, kind: input, shape index: {}]   ;;  %s2581_s10 = inlined_call_operand.vmem [shape: f32[1,32], index: 10, kind: input, shape index: {}]   ;;  %s2582_s11 = inlined_call_operand.vmem [shape: f32[32,64], index: 11, kind: input, shape index: {}]   ;;  %s2583_s12 = inlined_call_operand.vmem [shape: f32[64,32], index: 12, kind: input, shape index: {}]   ;;  %s2584_s13 = inlined_call_operand.vmem [shape: f32[1,64], index: 13, kind: input, shape index: {}]   ;;  %s2585_s14 = inlined_call_operand.vmem [shape: bf16[32,32], index: 14, kind: input, shape index: {}]   ;;  %s2586_s15 = inlined_call_operand.vmem [shape: f32[1,32], index: 15, kind: input, shape index: {}]   ;;  %s2587_s16 = inlined_call_operand.vmem [shape: bf16[96,32], index: 16, kind: input, shape index: {}]   ;;  %s2588_s17 = inlined_call_operand.vmem [shape: f32[1,32], index: 17, kind: input, shape index: {}]   ;;  %s2589_s18 = inlined_call_operand.vmem [shape: bf16[96,32], index: 18, kind: input, shape index: {}]   ;;  %s2590_s19 = inlined_call_operand.vmem [shape: f32[1,32], index: 19, kind: input, shape index: {}]   ;;  %s2591_s20 = inlined_call_operand.vmem [shape: bf16[96,256], index: 20, kind: input, shape index: {}]   ;;  %s2592_s21 = inlined_call_operand.vmem [shape: f32[1,256], index: 21, kind: input, shape index: {}]   ;;  %s2593_s22 = inlined_call_operand.vmem [shape: f32[2,8,256], index: 22, kind: output, shape index: {0}]   ;;  %s2594_s23 = inlined_call_operand.vmem [shape: s32[1,16], index: 23, kind: output, shape index: {1}]   ;;  %s2595_s24 = inlined_call_operand.hbm [shape: f32[1,1], index: 24, kind: output, shape index: {2}]   ;;  %s2596_s25 = inlined_call_operand.hbm [shape: f32[1,1], index: 25, kind: output, shape index: {3}]  }
   0x1   :  { %2602 = sst [smem:[#allocation9_spill]] %s2571_s0 }
   0x2   :  { %2603 = sst [smem:[#allocation10_spill]] %s2572_s1 }
   0x3   :  { %2604 = sst [smem:[#allocation11_spill]] %s2573_s2 }
   0x4   :  { %2605 = sst [smem:[#allocation12_spill]] %s2574_s3 }
   0x5   :  { %2606 = sst [smem:[#allocation13_spill]] %s2575_s4 }
   0x6   :  { %2607 = sst [smem:[#allocation14_spill]] %s2576_s5 }
   0x7   :  { %2608 = sst [smem:[#allocation15_spill]] %s2577_s6 }
   0x8   :  { %2609 = sst [smem:[#allocation16_spill]] %s2578_s7 }
   0x9   :  { %2610 = sst [smem:[#allocation17_spill]] %s2579_s8 }
   0xa   :  { %2611 = sst [smem:[#allocation18_spill]] %s2580_s9 }
   0xb   :  { %31 = vsyncpa [#allocation4], 0  ;;  %s2612_s6 = sld [smem:[#allocation10_spill]]  ;;  %vm105_vm0 = vcmask 1045504   ;;  %s2613_s3 = sld [smem:[#allocation9_spill]]  ;;  %vm98_vm1 = vcmask 97280  }
  0x11   :  { %v1853_v0 = vld [vmem:[%s2612_s6] sm:$0x3f]   ;;  %v79_v2 = vld [vmem:[%s2613_s3 + $0x8] sm:$0xff]  ;;  %v80_v3 = vld [vmem:[%s2613_s3 + $0x10] sm:$0xff] }
  0x12   :  { %v78_v1 = vld [vmem:[%s2613_s3] sm:$0xff]  ;;  %1779 = vmatprep.subr.msk.bf16.mxu0 %vm105_vm0, %v1853_v0  ;;  %v107_v4 = vsel %vm105_vm0, %v1853_v0, 0  ;;  %v81_v6 = vld [vmem:[%s2613_s3 + $0x18] sm:$0xff] }
  0x13   :  { %v82_v5 = vpack.c.bf16 %v79_v2, %v78_v1  ;;  %1624 = vmatpush3.bf16.msra.mxu0 %v107_v4  ;;  %v83_v7 = vpack.c.bf16 %v81_v6, %v80_v3 }
  0x15   :  { %1625 = vmatprep.mubr.msk.bf16.mxu0 %vm98_vm1, %v82_v5 }
  0x16   :  { %1626 = vmatmul.mubr.msk.bf16.vlgmr.msra.gmra.mrb[0].mxu0 %vm98_vm1, %v83_v7 }
  0x17   :  { %32 = vsyncpa [#allocation6], 0  ;;  %vm158_vm2 = vcmask 253952   ;;  %vm163_vm3 = vcmask 261120   ;;  %v1958_v8 = vmov 0.0   ;;  %s2614_s0 = sld [smem:[#allocation12_spill]] }
  0x18   :  { %160 = vst.msk [vmem:[#allocation2 + $0x20] sm:$0x1] %vm158_vm2, %v1958_v8  ;;  %159 = vst.msk [vmem:[#allocation2] sm:$0x1] %vm158_vm2, %v1958_v8  ;;  %1629 = vmatprep.subr.bf16.mxu1 %v1958_v8  ;;  %1645 = vmatprep.subr.bf16.mxu0 %v1958_v8  ;;  %s2615_s8 = sld [smem:[#allocation11_spill]]  ;;  %vm303_vm4 = vcmask 256000  }
  0x19   :  { %443 = vst.msk [vmem:[#allocation2 + $0x19] sm:$0x1] %vm158_vm2, %v1958_v8  ;;  %445 = vst.msk [vmem:[#allocation2 + $0x39] sm:$0x1] %vm158_vm2, %v1958_v8  ;;  %vm1959_vm5 = vmmov 0   ;;  %s1960_s5 = smov 32  }
  0x1a   :  { %442 = vst.msk [vmem:[#allocation2 + $0x11] sm:$0xff] %vm163_vm3, %v1958_v8  ;;  %444 = vst.msk [vmem:[#allocation2 + $0x31] sm:$0xff] %vm163_vm3, %v1958_v8  ;;  %1641 = vmatprep.mubr.msk.bf16.mxu1 %vm1959_vm5, %v1958_v8  ;;  %1657 = vmatprep.mubr.msk.bf16.mxu0 %vm1959_vm5, %v1958_v8  ;;  %vm197_vm6 = vcmask 523264   ;;  %vm256_vm7 = vcmask 785408   ;;  %s2616_s6 = sld [smem:[#allocation14_spill]]  ;;  %s2617_s28 = sld [smem:[#allocation13_spill]] }
  0x1b   :  { %s2618_s3 = sld [smem:[#allocation16_spill]]  ;;  %s2621_s7 = sld [smem:[#allocation17_spill]]  ;;  %vm939_vm13 = vcmask 130112   ;;  %vm941_vm14 = vcmask 122880   ;;  %vm944_vm0 = vcmask 0  }
  0x1d   :  { %v1854_v9 = vld [vmem:[%s2614_s0] sm:$0xff]   ;;  %v1855_v10 = vld [vmem:[%s2614_s0 + $0x8] sm:$0xff]   ;;  %v1856_v11 = vld [vmem:[%s2614_s0 + $0x10] sm:$0xff]  }
  0x1e   :  { %1630 = vmatpush3.bf16.msra.mxu1 %v1854_v9  ;;  %v1857_v12 = vld [vmem:[%s2614_s0 + $0x18] sm:$0xff]   ;;  %v1491_v13 = vld [vmem:[%s2615_s8] ss:$0 sm:$0xff]  ;;  %v1859_v23 = vld [vmem:[%s2614_s0 + $0x28] sm:$0xff]   ;;  %s2620_s8 = sld [smem:[#allocation18_spill]] }
  0x1f   :  { %1631 = vmatprep.subr.bf16.mxu1 %v1958_v8  ;;  %v1858_v21 = vld [vmem:[%s2614_s0 + $0x20] sm:$0xff]   ;;  %s1961_s0 = smov 64  }
  0x20   :  { %v1860_v43 = vld [vmem:[%s2616_s6] sm:$0xff]   ;;  %v1861_v44 = vld [vmem:[%s2616_s6 + $0x8] sm:$0xff]   ;;  %v1862_v45 = vld [vmem:[%s2616_s6 + $0x10] sm:$0xff]  }
  0x21   :  { %1646 = vmatpush3.bf16.msra.mxu0 %v1860_v43  ;;  %v1863_v46 = vld [vmem:[%s2616_s6 + $0x18] sm:$0xff]   ;;  %v1495_v47 = vld [vmem:[%s2617_s28] ss:$0 sm:$0xff]  ;;  %v1865_v57 = vld [vmem:[%s2616_s6 + $0x28] sm:$0xff]  }
  0x22   :  { %1632 = vmatpush3.bf16.msra.mxu1 %v1855_v10  ;;  %1647 = vmatprep.subr.bf16.mxu0 %v1958_v8  ;;  %v1864_v55 = vld [vmem:[%s2616_s6 + $0x20] sm:$0xff]   ;;  %s2619_s6 = sld [smem:[#allocation15_spill]] }
  0x23   :  { %1633 = vmatprep.subr.bf16.mxu1 %v1958_v8 }
  0x25   :  { %1648 = vmatpush3.bf16.msra.mxu0 %v1861_v44 }
  0x26   :  { %1634 = vmatpush3.bf16.msra.mxu1 %v1856_v11  ;;  %1649 = vmatprep.subr.bf16.mxu0 %v1958_v8 }
  0x27   :  { %1635 = vmatprep.subr.bf16.mxu1 %v1958_v8 }
  0x29   :  { %1650 = vmatpush3.bf16.msra.mxu0 %v1862_v45 }
  0x2a   :  { %1636 = vmatpush3.bf16.msra.mxu1 %v1857_v12  ;;  %1651 = vmatprep.subr.bf16.mxu0 %v1958_v8 }
  0x2b   :  { %1637 = vmatprep.subr.bf16.mxu1 %v1958_v8 }
  0x2d   :  { %1652 = vmatpush3.bf16.msra.mxu0 %v1863_v46 }
  0x2e   :  { %1638 = vmatpush3.bf16.msra.mxu1 %v1858_v21  ;;  %1653 = vmatprep.subr.bf16.mxu0 %v1958_v8  ;;  %v1868_v21 = vld [vmem:[%s2618_s3 + $0x10] sm:$0xff]  }
  0x2f   :  { %1639 = vmatprep.subr.bf16.mxu1 %v1958_v8 }
  0x31   :  { %1654 = vmatpush3.bf16.msra.mxu0 %v1864_v55 }
  0x32   :  { %1640 = vmatpush3.bf16.msra.mxu1 %v1859_v23  ;;  %1655 = vmatprep.subr.bf16.mxu0 %v1958_v8  ;;  %v1870_v23 = vld [vmem:[%s2618_s3 + $0x20] sm:$0xff]  }
  0x33   :  { %1661 = vmatprep.subr.bf16.mxu1 %v1958_v8 }
  0x35   :  { %1656 = vmatpush3.bf16.msra.mxu0 %v1865_v57 }
  0x36   :  { %1677 = vmatprep.subr.bf16.mxu0 %v1958_v8 }
  0xe9   :  { %v1627_v14 = vpop.f32.mrb[0].mxu0 }
  0xea   :  { %v152_v15 = vadd.f32 %v1627_v14, %v1491_v13  ;;  %v143_v16 = vpop.f32.mrb[1].mxu0  ;;  %v452_v14 = vld [vmem:[#allocation2 + $0x12] sm:$0xff] }
  0xeb   :  { %v144_v17 = vadd.f32 %v1491_v13, %v143_v16  ;;  %v1628_v18 = vpop.f32.mrb[2].mxu0  ;;  %1020 = vst.msk [vmem:[#allocation2 + $0x11] sm:$0xff] %vm163_vm3, %v1958_v8 }
  0xec   :  { %166 = vst.msk [vmem:[#allocation2 + $0x21] sm:$0xff] %vm163_vm3, %v152_v15  ;;  %v155_v19 = vadd.f32 %v1628_v18, %v1491_v13  ;;  %v146_v20 = vpop.f32.mrb[3].mxu0  ;;  %v453_v15 = vld [vmem:[#allocation2 + $0x32] sm:$0xff] }
  0xed   :  { %164 = vst.msk [vmem:[#allocation2 + $0x1] sm:$0xff] %vm163_vm3, %v144_v17  ;;  %v147_v22 = vadd.f32 %v1491_v13, %v146_v20  ;;  %1022 = vst.msk [vmem:[#allocation2 + $0x31] sm:$0xff] %vm163_vm3, %v1958_v8  ;;  %v1818_v16 = vpack.i.bf16 %v453_v15, %v452_v14  ;;  %v1866_v17 = vld [vmem:[%s2618_s3] sm:$0xff]  }
  0xee   :  { %167 = vst.msk [vmem:[#allocation2 + $0x29] sm:$0xff] %vm163_vm3, %v155_v19  ;;  %v1867_v19 = vld [vmem:[%s2618_s3 + $0x8] sm:$0xff]  }
  0xef   :  { %165 = vst.msk [vmem:[#allocation2 + $0x9] sm:$0xff] %vm163_vm3, %v147_v22  ;;  %v1869_v22 = vld [vmem:[%s2618_s3 + $0x18] sm:$0xff]  }
  0xf0   :  { %1023 = vst.msk [vmem:[#allocation2 + $0x39] sm:$0x1] %vm158_vm2, %v1958_v8  ;;  %1021 = vst.msk [vmem:[#allocation2 + $0x19] sm:$0x1] %vm158_vm2, %v1958_v8 }
  0xf5   :  { %v170_v24 = vld [vmem:[#allocation2 + $0x20] ss:$2 sm:$0xff]  ;;  %v174_v25 = vld [vmem:[#allocation2 + $0x21] ss:$2 sm:$0xff] }
  0xf6   :  { %v178_v26 = vld [vmem:[#allocation2 + $0x22] ss:$2 sm:$0xff]  ;;  %v172_v28 = vld [vmem:[#allocation2 + $0x1] ss:$2 sm:$0xff] }
  0xf7   :  { %307 = vst.msk [vmem:[#allocation2 + $0x2b] sm:$0x7] %vm303_vm4, %v1958_v8  ;;  %305 = vst.msk [vmem:[#allocation2 + $0x20] sm:$0x7] %vm303_vm4, %v1958_v8  ;;  %v168_v27 = vld [vmem:[#allocation2] ss:$2 sm:$0xff]  ;;  %v1793_v30 = vpack.i.bf16 %v174_v25, %v172_v28 }
  0xf8   :  { %v176_v29 = vld [vmem:[#allocation2 + $0x2] ss:$2 sm:$0xff] }
  0xf9   :  { %306 = vst.msk [vmem:[#allocation2 + $0xb] sm:$0x7] %vm303_vm4, %v1958_v8  ;;  %304 = vst.msk [vmem:[#allocation2] sm:$0x7] %vm303_vm4, %v1958_v8  ;;  %1794 = vrot.lane.b32.xlu0 %v1793_v30, %s1960_s5  ;;  %v1798_v31 = vpack.i.bf16 %v178_v26, %v176_v29 }
  0xfd   :  { %1799 = vrot.lane.b32.xlu0 %v1798_v31, %s1961_s0 }
 0x16b   :  { %v1795_v32 = vpop.permute.xlu0 %1794 }
 0x16c   :  { %v1797_v33 = vunpack.i.h.bf16 %v1795_v32  ;;  %v1796_v34 = vunpack.i.l.bf16 %v1795_v32 }
 0x16e   :  { %v196_v38 = vsel %vm163_vm3, %v170_v24, %v1797_v33  ;;  %v195_v39 = vsel %vm163_vm3, %v168_v27, %v1796_v34  ;;  %v1503_v24 = vld [vmem:[%s2619_s6] ss:$0 sm:$0xff]  ;;  %v1871_v33 = vld [vmem:[%s2618_s3 + $0x28] sm:$0xff]  }
 0x16f   :  { %v1800_v35 = vpop.permute.xlu0 %1799 }
 0x170   :  { %v1802_v36 = vunpack.i.h.bf16 %v1800_v35  ;;  %v1801_v37 = vunpack.i.l.bf16 %v1800_v35 }
 0x172   :  { %v198_v40 = vsel %vm197_vm6, %v195_v39, %v1801_v37  ;;  %v199_v41 = vsel %vm197_vm6, %v196_v38, %v1802_v36 }
 0x173   :  { %v200_v42 = vpack.c.bf16 %v199_v41, %v198_v40 }
 0x175   :  { %1642 = vmatmul.mubr.msk.bf16.vlgmr.msra.gmra.mrb[0].mxu1 %vm256_vm7, %v200_v42 }
 0x176   :  { %1673 = vmatprep.mubr.msk.bf16.mxu1 %vm1959_vm5, %v1958_v8  ;;  %1662 = vmatpush3.bf16.msra.mxu1 %v1866_v17 }
 0x177   :  { %1663 = vmatprep.subr.bf16.mxu1 %v1958_v8 }
 0x17a   :  { %1664 = vmatpush3.bf16.msra.mxu1 %v1867_v19 }
 0x17b   :  { %1665 = vmatprep.subr.bf16.mxu1 %v1958_v8 }
 0x17e   :  { %1666 = vmatpush3.bf16.msra.mxu1 %v1868_v21 }
 0x17f   :  { %1667 = vmatprep.subr.bf16.mxu1 %v1958_v8 }
 0x182   :  { %1668 = vmatpush3.bf16.msra.mxu1 %v1869_v22 }
 0x183   :  { %1669 = vmatprep.subr.bf16.mxu1 %v1958_v8 }
 0x186   :  { %1670 = vmatpush3.bf16.msra.mxu1 %v1870_v23 }
 0x187   :  { %1671 = vmatprep.subr.bf16.mxu1 %v1958_v8 }
 0x18a   :  { %1672 = vmatpush3.bf16.msra.mxu1 %v1871_v33 }
 0x18b   :  { %1723 = vmatprep.subr.bf16.mxu1 %v1958_v8 }
 0x248   :  { %v294_v48 = vpop.f32.mrb[0].mxu1 }
 0x249   :  { %v295_v49 = vadd.f32 %v1495_v47, %v294_v48  ;;  %v1643_v50 = vpop.f32.mrb[1].mxu1  ;;  %v1872_v48 = vld [vmem:[%s2620_s8] sm:$0xff]  }
 0x24a   :  { %v297_v51 = vpop.f32.mrb[2].mxu1  ;;  %v652_v50 = vld [vmem:[%s2582_s11] sm:$0xff] }
 0x24b   :  { %v301_v52 = vmax.f32 %v295_v49, 0.0  ;;  %v298_v53 = vadd.f32 %v1495_v47, %v297_v51  ;;  %v1644_v54 = vpop.f32.mrb[3].mxu1  ;;  %v1873_v49 = vld [vmem:[%s2620_s8 + $0x8] sm:$0xff]  }
 0x24c   :  { %v653_v51 = vld [vmem:[%s2582_s11 + $0x8] sm:$0xff] }
 0x24d   :  { %308 = vst.msk [vmem:[#allocation2 + $0x3] sm:$0xff] %vm163_vm3, %v301_v52  ;;  %v302_v56 = vmax.f32 %v298_v53, 0.0  ;;  %v1755_v52 = vpack.c.bf16 %v653_v51, %v652_v50  ;;  %v1511_v53 = vld [vmem:[%s2621_s7] ss:$0 sm:$0xff] }
 0x24f   :  { %309 = vst.msk [vmem:[#allocation2 + $0x23] sm:$0xff] %vm163_vm3, %v302_v56 }
 0x254   :  { %v314_v58 = vld [vmem:[#allocation2 + $0x6] sm:$0xff] }
 0x255   :  { %v312_v59 = vld [vmem:[#allocation2 + $0x3] sm:$0xff] }
 0x256   :  { %v310_v60 = vld [vmem:[#allocation2] sm:$0xff]  ;;  %439 = vst.msk [vmem:[#allocation2 + $0x8] sm:$0x1] %vm158_vm2, %v1958_v8 }
 0x257   :  { %438 = vst.msk [vmem:[#allocation2] sm:$0xff] %vm163_vm3, %v1958_v8  ;;  %v315_v61 = vld [vmem:[#allocation2 + $0x26] sm:$0xff] }
 0x258   :  { %v313_v62 = vld [vmem:[#allocation2 + $0x23] sm:$0xff]  ;;  %1017 = vst.msk [vmem:[#allocation2 + $0x8] sm:$0x1] %vm158_vm2, %v1958_v8  ;;  %v1808_v1 = vpack.i.bf16 %v315_v61, %v314_v58 }
 0x259   :  { %v311_v63 = vld [vmem:[#allocation2 + $0x20] sm:$0xff]  ;;  %v1803_v0 = vpack.i.bf16 %v313_v62, %v312_v59  ;;  %441 = vst.msk [vmem:[#allocation2 + $0x28] sm:$0x1] %vm158_vm2, %v1958_v8 }
 0x25a   :  { %440 = vst.msk [vmem:[#allocation2 + $0x20] sm:$0xff] %vm163_vm3, %v1958_v8 }
 0x25b   :  { %1019 = vst.msk [vmem:[#allocation2 + $0x28] sm:$0x1] %vm158_vm2, %v1958_v8  ;;  %1804 = vrot.lane.b32.xlu1 %v1803_v0, %s1960_s5  ;;  %v655_v0 = vld [vmem:[%s2582_s11 + $0x18] sm:$0xff] }
 0x25e   :  { %v448_v18 = vld [vmem:[#allocation2] sm:$0xff] }
 0x25f   :  { %1809 = vrot.lane.b32.xlu1 %v1808_v1, %s1961_s0  ;;  %1016 = vst.msk [vmem:[#allocation2] sm:$0xff] %vm163_vm3, %v1958_v8 }
 0x261   :  { %v449_v20 = vld [vmem:[#allocation2 + $0x20] sm:$0xff] }
 0x262   :  { %1018 = vst.msk [vmem:[#allocation2 + $0x20] sm:$0xff] %vm163_vm3, %v1958_v8 }
 0x263   :  { %1819 = vrot.lane.b32.xlu1 %v1818_v16, %s1961_s0 }
 0x2cd   :  { %v1805_v2 = vpop.permute.xlu1 %1804 }
 0x2ce   :  { %v1807_v3 = vunpack.i.h.bf16 %v1805_v2  ;;  %v1806_v4 = vunpack.i.l.bf16 %v1805_v2  ;;  %v1519_v2 = vld [vmem:[%s2581_s10] ss:$0 sm:$0xff] }
 0x2d0   :  { %v332_v9 = vsel %vm163_vm3, %v310_v60, %v1806_v4  ;;  %v333_v10 = vsel %vm163_vm3, %v311_v63, %v1807_v3  ;;  %v654_v63 = vld [vmem:[%s2582_s11 + $0x10] sm:$0xff] }
 0x2d1   :  { %v1810_v5 = vpop.permute.xlu1 %1809  ;;  %v1759_v1 = vpack.c.bf16 %v655_v0, %v654_v63 }
 0x2d2   :  { %v1812_v6 = vunpack.i.h.bf16 %v1810_v5  ;;  %v1811_v7 = vunpack.i.l.bf16 %v1810_v5 }
 0x2d4   :  { %v334_v11 = vsel %vm197_vm6, %v332_v9, %v1811_v7  ;;  %v335_v12 = vsel %vm197_vm6, %v333_v10, %v1812_v6 }
 0x2d5   :  { %v336_v13 = vpack.c.bf16 %v335_v12, %v334_v11  ;;  %v1820_v37 = vpop.permute.xlu1 %1819 }
 0x2d6   :  { %v1822_v39 = vunpack.i.h.bf16 %v1820_v37  ;;  %v1821_v40 = vunpack.i.l.bf16 %v1820_v37 }
 0x2d7   :  { %1658 = vmatmul.mubr.msk.bf16.vlgmr.msra.gmra.mrb[4].mxu0 %vm256_vm7, %v336_v13 }
 0x2d8   :  { %1681 = vmatprep.mubr.msk.bf16.mxu0 %vm1959_vm5, %v1958_v8  ;;  %1678 = vmatpush3.bf16.msra.mxu0 %v1872_v48 }
 0x2d9   :  { %1679 = vmatprep.subr.bf16.mxu0 %v1958_v8 }
 0x2dc   :  { %1680 = vmatpush3.bf16.msra.mxu0 %v1873_v49 }
 0x2dd   :  { %1756 = vmatprep.subr.bf16.mxu0 %v1755_v52 }
 0x3aa   :  { %v429_v25 = vpop.f32.mrb[4].mxu0 }
 0x3ab   :  { %v430_v26 = vadd.f32 %v1503_v24, %v429_v25  ;;  %v1659_v27 = vpop.f32.mrb[5].mxu0 }
 0x3ac   :  { %v432_v28 = vpop.f32.mrb[6].mxu0  ;;  %v750_v27 = vlaneseq }
 0x3ad   :  { %v436_v29 = vmax.f32 %v430_v26, 0.0  ;;  %v433_v30 = vadd.f32 %v1503_v24, %v432_v28  ;;  %v1660_v31 = vpop.f32.mrb[7].mxu0 }
 0x3ae   :  { %v2321_v28 = vand.u32 127, %v750_v27 }
 0x3af   :  { %446 = vst.msk [vmem:[#allocation2 + $0x9] sm:$0xff] %vm163_vm3, %v436_v29  ;;  %v437_v32 = vmax.f32 %v433_v30, 0.0 }
 0x3b1   :  { %447 = vst.msk [vmem:[#allocation2 + $0x29] sm:$0xff] %vm163_vm3, %v437_v32 }
 0x3b6   :  { %v450_v34 = vld [vmem:[#allocation2 + $0x9] sm:$0xff] }
 0x3b8   :  { %v451_v35 = vld [vmem:[#allocation2 + $0x29] sm:$0xff] }
 0x3b9   :  { %v1813_v36 = vpack.i.bf16 %v451_v35, %v450_v34 }
 0x3bb   :  { %1814 = vrot.lane.b32.xlu0 %v1813_v36, %s1960_s5 }
 0x42d   :  { %v1815_v38 = vpop.permute.xlu0 %1814 }
 0x42e   :  { %v1817_v41 = vunpack.i.h.bf16 %v1815_v38  ;;  %v1816_v42 = vunpack.i.l.bf16 %v1815_v38 }
 0x430   :  { %v471_v43 = vsel %vm163_vm3, %v449_v20, %v1817_v41  ;;  %v470_v44 = vsel %vm163_vm3, %v448_v18, %v1816_v42  ;;  %v1525_v20 = vld [vmem:[%s2584_s13] ss:$0 sm:$0xff]  ;;  %v800_v41 = vld [vmem:[%s2583_s12 + $0x10] sm:$0xff] }
 0x431   :  { %v472_v45 = vsel %vm197_vm6, %v470_v44, %v1821_v40  ;;  %v473_v46 = vsel %vm197_vm6, %v471_v43, %v1822_v39  ;;  %v798_v39 = vld [vmem:[%s2583_s12] sm:$0xff]  ;;  %v799_v40 = vld [vmem:[%s2583_s12 + $0x8] sm:$0xff]  ;;  %v801_v43 = vld [vmem:[%s2583_s12 + $0x18] sm:$0xff] }
 0x432   :  { %v474_v47 = vpack.c.bf16 %v473_v46, %v472_v45  ;;  %v1763_v42 = vpack.c.bf16 %v799_v40, %v798_v39  ;;  %v1767_v44 = vpack.c.bf16 %v801_v43, %v800_v41  ;;  %v1880_v39 = vld [vmem:[%s2587_s16 + $0x20] sm:$0xff]  }
 0x433   :  { %v1530_v40 = vld [vmem:[%s2586_s15] ss:$0 sm:$0xff] }
 0x434   :  { %1674 = vmatmul.mubr.msk.bf16.vlgmr.msra.gmra.mrb[4].mxu1 %vm256_vm7, %v474_v47 }
 0x435   :  { %1735 = vmatprep.mubr.msk.bf16.mxu1 %vm1959_vm5, %v1958_v8 }
 0x507   :  { %v567_v54 = vpop.f32.mrb[4].mxu1 }
 0x508   :  { %v568_v55 = vadd.f32 %v1511_v53, %v567_v54  ;;  %v1675_v56 = vpop.f32.mrb[5].mxu1  ;;  %v803_v54 = vld [vmem:[%s2583_s12 + $0x28] sm:$0xff] }
 0x509   :  { %v570_v57 = vpop.f32.mrb[6].mxu1  ;;  %v804_v56 = vld [vmem:[%s2583_s12 + $0x30] sm:$0xff] }
 0x50a   :  { %v571_v58 = vadd.f32 %v1511_v53, %v570_v57  ;;  %v1676_v59 = vpop.f32.mrb[7].mxu1  ;;  %v574_v60 = vmax.f32 %v568_v55, 0.0  ;;  %v802_v53 = vld [vmem:[%s2583_s12 + $0x20] sm:$0xff]  ;;  %v805_v57 = vld [vmem:[%s2583_s12 + $0x38] sm:$0xff] }
 0x50b   :  { %v1771_v55 = vpack.c.bf16 %v803_v54, %v802_v53 }
 0x50c   :  { %v575_v61 = vmax.f32 %v571_v58, 0.0  ;;  %v1775_v58 = vpack.c.bf16 %v805_v57, %v804_v56 }
 0x50e   :  { %v576_v62 = vpack.c.bf16 %v575_v61, %v574_v60  ;;  %v2352_v60 = vshrl.u32 %v750_v27, 7 }
 0x510   :  { %1682 = vmatmul.mubr.msk.bf16.vlgmr.msra.gmra.mrb[8].mxu0 %vm163_vm3, %v576_v62 }
 0x511   :  { %1758 = vmatpush3.bf16.msra.mxu0 %v1755_v52 }
 0x512   :  { %1760 = vmatprep.subr.bf16.mxu0 %v1759_v1 }
 0x515   :  { %1762 = vmatpush3.bf16.msra.mxu0 %v1759_v1  ;;  %v934_v1 = vadd.s32 4294967288, %v2321_v28 }
 0x516   :  { %1764 = vmatprep.subr.bf16.mxu0 %v1763_v42 }
 0x5e3   :  { %v637_v3 = vpop.f32.mrb[8].mxu0 }
 0x5e4   :  { %v2302_v4 = vadd.f32 %v1519_v2, %v637_v3  ;;  %v1683_v5 = vpop.f32.mrb[9].mxu0  ;;  %v932_v3 = vsub.s32 %v2321_v28, %v2352_v60 }
 0x5e5   :  { %v640_v6 = vpop.f32.mrb[10].mxu0 }
 0x5e6   :  { %v2304_v7 = vadd.f32 %v1519_v2, %v640_v6  ;;  %v1684_v9 = vpop.f32.mrb[11].mxu0  ;;  %1693 = vmatprep.mubr.msk.f32.mxu0 %vm163_vm3, %v2302_v4  ;;  %v644_v10 = vmul.f32 %v2302_v4, %v2302_v4 }
 0x5e7   :  { %v937_v9 = vsub.s32 %v934_v1, %v2352_v60  ;;  %v1884_v1 = vld [vmem:[%s2589_s18 + $0x10] sm:$0xff]  }
 0x5e8   :  { %1694 = vmatmul.mubr.msk.f32.vlgmr.msra.gmra.mrb[12].mxu0 %vm163_vm3, %v2304_v7  ;;  %v646_v11 = vsel %vm163_vm3, %v644_v10, 0.0  ;;  %v645_v12 = vmul.f32 %v2304_v7, %v2304_v7 }
 0x5e9   :  { %647 = vadd.xlane.f32.xlu0 %v646_v11  ;;  %1766 = vmatpush3.bf16.msra.mxu0 %v1763_v42 }
 0x5ea   :  { %v649_v13 = vsel %vm163_vm3, %v645_v12, 0.0  ;;  %1768 = vmatprep.subr.bf16.mxu0 %v1767_v44 }
 0x5eb   :  { %650 = vadd.xlane.f32.xlu1 %v649_v13  ;;  %v1874_v13 = vld [vmem:[%s2585_s14] sm:$0xff]  }
 0x5ed   :  { %1770 = vmatpush3.bf16.msra.mxu0 %v1767_v44 }
 0x5ee   :  { %1772 = vmatprep.subr.bf16.mxu0 %v1771_v55 }
 0x5f1   :  { %1774 = vmatpush3.bf16.msra.mxu0 %v1771_v55 }
 0x5f2   :  { %1776 = vmatprep.subr.bf16.mxu0 %v1775_v58 }
 0x5f5   :  { %1778 = vmatpush3.bf16.msra.mxu0 %v1775_v58 }
 0x5f6   :  { %1715 = vmatprep.subr.bf16.mxu0 %v1958_v8 }
 0x676   :  { %v648_v18 = vpop.xlane.xlu0 %647 }
 0x678   :  { %v651_v19 = vpop.xlane.xlu1 %650 }
 0x6bb   :  { %v1695_v14 = vpop.f32.mrb[12].mxu0 }
 0x6bc   :  { %v738_v15 = vmul.f32 2.0, %v1695_v14  ;;  %v728_v16 = vpop.f32.mrb[13].mxu0 }
 0x6bd   :  { %v737_v17 = vmul.f32 2.0, %v728_v16 }
 0x6be   :  { %v740_v21 = vsub.f32 %v651_v19, %v738_v15 }
 0x6bf   :  { %v739_v22 = vsub.f32 %v648_v18, %v737_v17 }
 0x6c0   :  { %v749_v25 = vadd.f32 %v1525_v20, %v740_v21  ;;  %v1875_v21 = vld [vmem:[%s2585_s14 + $0x8] sm:$0xff]  }
 0x6c1   :  { %v748_v23 = vadd.f32 %v1525_v20, %v739_v22 }
 0x6c2   :  { %v755_v26 = vsel %vm197_vm6, %v749_v25, inf }
 0x6c3   :  { %v752_v24 = vsel %vm197_vm6, %v748_v23, inf }
 0x6c4   :  { %753 = vmin.xlane.f32.xlu0 %v752_v24 }
 0x6c8   :  { %756 = vmin.xlane.f32.xlu0 %v755_v26 }
 0x751   :  { %v754_v29 = vpop.xlane.xlu0 %753 }
 0x752   :  { %vm758_vm8 = vcmp.le.f32.partialorder %v748_v23, %v754_v29 }
 0x753   :  { %v760_v30 = vsel %vm758_vm8, %v2321_v28, 64 }
 0x754   :  { %v762_v31 = vsel %vm197_vm6, %v760_v30, 2147483647 }
 0x755   :  { %v757_v32 = vpop.xlane.xlu0 %756  ;;  %v764_v33 = vshra.s32 %v762_v31, 16  ;;  %v763_v45 = vand.u32 65535, %v762_v31 }
 0x756   :  { %vm759_vm9 = vcmp.le.f32.partialorder %v749_v25, %v757_v32  ;;  %v1030_v32 = vld [vmem:[#allocation2 + $0x12] sm:$0xff] }
 0x757   :  { %v761_v34 = vsel %vm759_vm9, %v2321_v28, 64  ;;  %v766_v35 = vcvt.s32.f32 %v764_v33  ;;  %v765_v47 = vcvt.s32.f32 %v763_v45  ;;  %v1031_v33 = vld [vmem:[#allocation2 + $0x32] sm:$0xff] }
 0x758   :  { %v777_v36 = vsel %vm197_vm6, %v761_v34, 2147483647  ;;  %v1026_v34 = vld [vmem:[#allocation2] sm:$0xff] }
 0x759   :  { %767 = vmin.xlane.f32.xlu1 %v766_v35  ;;  %v779_v37 = vshra.s32 %v777_v36, 16  ;;  %v778_v48 = vand.u32 65535, %v777_v36  ;;  %v1027_v36 = vld [vmem:[#allocation2 + $0x20] sm:$0xff]  ;;  %1154 = vst.msk [vmem:[#allocation2] sm:$0x7] %vm303_vm4, %v1958_v8 }
 0x75a   :  { %1155 = vst.msk [vmem:[#allocation2 + $0x20] sm:$0x7] %vm303_vm4, %v1958_v8 }
 0x75b   :  { %v781_v38 = vcvt.s32.f32 %v779_v37  ;;  %v780_v51 = vcvt.s32.f32 %v778_v48  ;;  %v1878_v37 = vld [vmem:[%s2587_s16 + $0x10] sm:$0xff]  }
 0x75d   :  { %782 = vmin.xlane.f32.xlu0 %v781_v38 }
 0x7e6   :  { %v768_v46 = vpop.xlane.xlu1 %767 }
 0x7e7   :  { %vm769_vm10 = vcmp.eq.f32.partialorder %v766_v35, %v768_v46  ;;  %v774_v59 = vcvt.f32.s32 %v768_v46  ;;  %v1877_v35 = vld [vmem:[%s2587_s16 + $0x8] sm:$0xff]  }
 0x7e8   :  { %v770_v49 = vsel %vm769_vm10, %v765_v47, inf  ;;  %v1881_v47 = vld [vmem:[%s2587_s16 + $0x28] sm:$0xff]  }
 0x7e9   :  { %771 = vmin.xlane.f32.xlu1 %v770_v49  ;;  %v775_v62 = vshll.u32 %v774_v59, 16 }
 0x7ea   :  { %v783_v50 = vpop.xlane.xlu0 %782 }
 0x7eb   :  { %vm784_vm11 = vcmp.eq.f32.partialorder %v781_v38, %v783_v50  ;;  %v789_v63 = vcvt.f32.s32 %v783_v50  ;;  %v1879_v38 = vld [vmem:[%s2587_s16 + $0x18] sm:$0xff]  }
 0x7ec   :  { %v785_v52 = vsel %vm784_vm11, %v780_v51, inf }
 0x7ed   :  { %786 = vmin.xlane.f32.xlu0 %v785_v52  ;;  %v790_v6 = vshll.u32 %v789_v63, 16  ;;  %v1882_v63 = vld [vmem:[%s2589_s18] sm:$0xff]  }
 0x876   :  { %v772_v61 = vpop.xlane.xlu1 %771 }
 0x877   :  { %v773_v0 = vcvt.f32.s32 %v772_v61 }
 0x879   :  { %v776_v2 = vadd.s32 %v775_v62, %v773_v0  ;;  %v1883_v0 = vld [vmem:[%s2589_s18 + $0x8] sm:$0xff]  }
 0x87a   :  { %v787_v5 = vpop.xlane.xlu0 %786 }
 0x87b   :  { %v788_v10 = vcvt.f32.s32 %v787_v5  ;;  %vm792_vm12 = vcmp.eq.s32.totalorder %v2321_v28, %v776_v2  ;;  %v933_v14 = vrot.slane %v776_v2, %v932_v3  ;;  %v1885_v2 = vld [vmem:[%s2589_s18 + $0x18] sm:$0xff]   ;;  %v1534_v3 = vld [vmem:[%s2588_s17] ss:$0 sm:$0xff] }
 0x87c   :  { %v1526_v11 = vsel %vm792_vm12, 1.0, %v1958_v8 }
 0x87d   :  { %v791_v12 = vadd.s32 %v790_v6, %v788_v10  ;;  %1712 = vmatprep.mubr.msk.f32.mxu0 %vm197_vm6, %v1526_v11  ;;  %v906_v18 = vsel %vm197_vm6, %v1526_v11, 0.0 }
 0x87f   :  { %vm793_vm15 = vcmp.eq.s32.totalorder %v2321_v28, %v791_v12  ;;  %v938_v15 = vrot.slane %v791_v12, %v937_v9 }
 0x880   :  { %v1527_v16 = vsel %vm793_vm15, 1.0, %v1958_v8 }
 0x881   :  { %v940_v17 = vsel %vm939_vm13, %v938_v15, %v933_v14  ;;  %v907_v19 = vsel %vm197_vm6, %v1527_v16, 0.0  ;;  %1713 = vmatmul.mubr.msk.f32.vlgmr.msra.gmra.mrb[14].mxu0 %vm197_vm6, %v1527_v16  ;;  %v1886_v14 = vld [vmem:[%s2589_s18 + $0x20] sm:$0xff]   ;;  %v1887_v16 = vld [vmem:[%s2589_s18 + $0x28] sm:$0xff]  }
 0x882   :  { %942 = vst.msk [vmem:[%s2594_s23] sm:$0x1] %vm941_vm14, %v940_v17  ;;  %v2372_v20 = vadd.f32 %v907_v19, %v906_v18  ;;  %1716 = vmatpush3.bf16.msra.mxu0 %v1874_v13  ;;  %1719 = vmatprep.mubr.msk.bf16.mxu0 %vm1959_vm5, %v1958_v8 }
 0x883   :  { %1717 = vmatprep.subr.bf16.mxu0 %v1958_v8 }
 0x886   :  { %1718 = vmatpush3.bf16.msra.mxu0 %v1875_v21 }
 0x887   :  { %1739 = vmatprep.subr.bf16.mxu0 %v1958_v8 }
 0x954   :  { %v1714_v22 = vpop.f32.mrb[14].mxu0 }
 0x955   :  { %v888_v23 = vsub.f32 %v2304_v7, %v1714_v22  ;;  %v878_v24 = vpop.f32.mrb[15].mxu0  ;;  %v1828_v7 = vpack.i.bf16 %v1031_v33, %v1030_v32 }
 0x956   :  { %v887_v25 = vsub.f32 %v2302_v4, %v878_v24  ;;  %v948_v26 = vpack.c.bf16 %v1714_v22, %v878_v24  ;;  %v1876_v4 = vld [vmem:[%s2587_s16] sm:$0xff]  }
 0x957   :  { %v890_v27 = vmul.f32 %v888_v23, %v888_v23  ;;  %1829 = vrot.lane.b32.xlu0 %v1828_v7, %s1961_s0  ;;  %1724 = vmatpush3.bf16.msra.mxu1 %v1876_v4 }
 0x958   :  { %v889_v28 = vmul.f32 %v887_v25, %v887_v25  ;;  %1720 = vmatmul.mubr.msk.bf16.vlgmr.msra.gmra.mrb[16].mxu0 %vm163_vm3, %v948_v26  ;;  %1725 = vmatprep.subr.bf16.mxu1 %v1958_v8 }
 0x959   :  { %1751 = vmatprep.mubr.msk.bf16.mxu0 %vm1959_vm5, %v1958_v8  ;;  %v892_v29 = vsel %vm163_vm3, %v890_v27, 0.0  ;;  %1740 = vmatpush3.bf16.msra.mxu0 %v1882_v63 }
 0x95a   :  { %v891_v30 = vsel %vm163_vm3, %v889_v28, 0.0  ;;  %1741 = vmatprep.subr.bf16.mxu0 %v1958_v8 }
 0x95b   :  { %v2388_v31 = vadd.f32 %v892_v29, %v891_v30  ;;  %1726 = vmatpush3.bf16.msra.mxu1 %v1877_v35  ;;  %v1888_v35 = vld [vmem:[%s2591_s20] ss:$8 sps:$4 sm:$0xff]  }
 0x95c   :  { %1727 = vmatprep.subr.bf16.mxu1 %v1958_v8 }
 0x95d   :  { %1742 = vmatpush3.bf16.msra.mxu0 %v1883_v0 }
 0x95e   :  { %1743 = vmatprep.subr.bf16.mxu0 %v1958_v8 }
 0x95f   :  { %1728 = vmatpush3.bf16.msra.mxu1 %v1878_v37  ;;  %v1893_v37 = vld [vmem:[%s2591_s20 + $0x14] ss:$8 sps:$4 sm:$0xff]  }
 0x960   :  { %1729 = vmatprep.subr.bf16.mxu1 %v1958_v8 }
 0x961   :  { %1744 = vmatpush3.bf16.msra.mxu0 %v1884_v1 }
 0x962   :  { %1745 = vmatprep.subr.bf16.mxu0 %v1958_v8 }
 0x963   :  { %1730 = vmatpush3.bf16.msra.mxu1 %v1879_v38  ;;  %v1891_v38 = vld [vmem:[%s2591_s20 + $0x10] ss:$8 sps:$4 sm:$0xff]  }
 0x964   :  { %1731 = vmatprep.subr.bf16.mxu1 %v1958_v8 }
 0x965   :  { %1746 = vmatpush3.bf16.msra.mxu0 %v1885_v2 }
 0x966   :  { %1747 = vmatprep.subr.bf16.mxu0 %v1958_v8 }
 0x967   :  { %1732 = vmatpush3.bf16.msra.mxu1 %v1880_v39  ;;  %v1896_v39 = vld [vmem:[%s2591_s20 + $0x24] ss:$8 sps:$4 sm:$0xff]  }
 0x968   :  { %1733 = vmatprep.subr.bf16.mxu1 %v1958_v8 }
 0x969   :  { %1748 = vmatpush3.bf16.msra.mxu0 %v1886_v14 }
 0x96a   :  { %1749 = vmatprep.subr.bf16.mxu0 %v1958_v8 }
 0x96b   :  { %1734 = vmatpush3.bf16.msra.mxu1 %v1881_v47 }
 0x96d   :  { %1750 = vmatpush3.bf16.msra.mxu0 %v1887_v16 }
 0x9c9   :  { %v1830_v51 = vpop.permute.xlu0 %1829 }
 0x9ca   :  { %v1832_v53 = vunpack.i.h.bf16 %v1830_v51  ;;  %v1831_v54 = vunpack.i.l.bf16 %v1830_v51 }
 0xa2b   :  { %v1009_v41 = vpop.f32.mrb[16].mxu0 }
 0xa2c   :  { %v1010_v42 = vadd.f32 %v1530_v40, %v1009_v41  ;;  %v1721_v43 = vpop.f32.mrb[17].mxu0  ;;  %v1899_v41 = vld [vmem:[%s2591_s20 + $0x34] ss:$8 sps:$4 sm:$0xff]  }
 0xa2d   :  { %v1012_v44 = vpop.f32.mrb[18].mxu0  ;;  %v1902_v43 = vld [vmem:[%s2591_s20 + $0x44] ss:$8 sps:$4 sm:$0xff]  }
 0xa2e   :  { %1024 = vst.msk [vmem:[#allocation2 + $0x9] sm:$0xff] %vm163_vm3, %v1010_v42  ;;  %v1013_v45 = vadd.f32 %v1530_v40, %v1012_v44  ;;  %v1722_v46 = vpop.f32.mrb[19].mxu0  ;;  %v1894_v40 = vld [vmem:[%s2591_s20 + $0x20] ss:$8 sps:$4 sm:$0xff]   ;;  %v1897_v42 = vld [vmem:[%s2591_s20 + $0x30] ss:$8 sps:$4 sm:$0xff]  }
 0xa2f   :  { %v1900_v44 = vld [vmem:[%s2591_s20 + $0x40] ss:$8 sps:$4 sm:$0xff]   ;;  %v909_v46 = vrot.slane %v2372_v20, 4 }
 0xa30   :  { %1025 = vst.msk [vmem:[#allocation2 + $0x29] sm:$0xff] %vm163_vm3, %v1013_v45  ;;  %v1542_v45 = vld [vmem:[%s2590_s19] ss:$0 sm:$0xff] }
 0xa31   :  { %v910_v51 = vadd.f32 %v909_v46, %v2372_v20  ;;  %v1962_v20 = vmov 0  }
 0xa35   :  { %v1028_v48 = vld [vmem:[#allocation2 + $0x9] sm:$0xff] }
 0xa36   :  { %1156 = vst.msk [vmem:[#allocation2 + $0xb] sm:$0x7] %vm303_vm4, %v1958_v8 }
 0xa37   :  { %v1029_v49 = vld [vmem:[#allocation2 + $0x29] sm:$0xff] }
 0xa38   :  { %v1823_v50 = vpack.i.bf16 %v1029_v49, %v1028_v48  ;;  %1157 = vst.msk [vmem:[#allocation2 + $0x2b] sm:$0x7] %vm303_vm4, %v1958_v8 }
 0xa3a   :  { %1824 = vrot.lane.b32.xlu1 %v1823_v50, %s1960_s5 }
 0xaac   :  { %v1825_v52 = vpop.permute.xlu1 %1824 }
 0xaad   :  { %v1827_v55 = vunpack.i.h.bf16 %v1825_v52  ;;  %v1826_v56 = vunpack.i.l.bf16 %v1825_v52 }
 0xaaf   :  { %v1049_v57 = vsel %vm163_vm3, %v1027_v36, %v1827_v55  ;;  %v1048_v58 = vsel %vm163_vm3, %v1026_v34, %v1826_v56  ;;  %v1890_v36 = vld [vmem:[%s2591_s20 + $0x4] ss:$8 sps:$4 sm:$0xff]   ;;  %v1905_v55 = vld [vmem:[%s2591_s20 + $0x54] ss:$8 sps:$4 sm:$0xff]  }
 0xab0   :  { %v1051_v59 = vsel %vm197_vm6, %v1049_v57, %v1832_v53  ;;  %v1050_v61 = vsel %vm197_vm6, %v1048_v58, %v1831_v54  ;;  %1408 = vmatprep.subr.bf16.mxu1 %v1890_v36  ;;  %v1903_v57 = vld [vmem:[%s2591_s20 + $0x50] ss:$8 sps:$4 sm:$0xff]   ;;  %v911_v58 = vrot.slane %v910_v51, 2  ;;  %s1963_s20 = smov [#allocation3]  }
 0xab1   :  { %v1052_v62 = vpack.c.bf16 %v1051_v59, %v1050_v61 }
 0xab2   :  { %v912_v59 = vadd.f32 %v911_v58, %v910_v51 }
 0xab3   :  { %1736 = vmatmul.mubr.msk.bf16.vlgmr.msra.gmra.mrb[8].mxu1 %vm256_vm7, %v1052_v62 }
 0xab4   :  { %1409 = vmatpush1.bf16.msra.mxu1 %v1888_v35  ;;  %1440 = vmatprep.mubr.bf16.mxu1 %v1962_v20 }
 0xab5   :  { %1410 = vmatprep.subr.bf16.mxu1 %v1893_v37 }
 0xab8   :  { %1411 = vmatpush1.bf16.msra.mxu1 %v1891_v38 }
 0xab9   :  { %1412 = vmatprep.subr.bf16.mxu1 %v1896_v39 }
 0xabc   :  { %1413 = vmatpush1.bf16.msra.mxu1 %v1894_v40 }
 0xabd   :  { %1414 = vmatprep.subr.bf16.mxu1 %v1899_v41 }
 0xac0   :  { %1415 = vmatpush1.bf16.msra.mxu1 %v1897_v42 }
 0xac1   :  { %1416 = vmatprep.subr.bf16.mxu1 %v1902_v43 }
 0xac4   :  { %1417 = vmatpush1.bf16.msra.mxu1 %v1900_v44 }
 0xac5   :  { %1418 = vmatprep.subr.bf16.mxu1 %v1905_v55 }
 0xac8   :  { %1419 = vmatpush1.bf16.msra.mxu1 %v1903_v57 }
 0xb86   :  { %v1145_v5 = vpop.f32.mrb[8].mxu1 }
 0xb87   :  { %v1146_v6 = vadd.f32 %v1534_v3, %v1145_v5  ;;  %v1737_v9 = vpop.f32.mrb[9].mxu1 }
 0xb88   :  { %v1148_v10 = vpop.f32.mrb[10].mxu1 }
 0xb89   :  { %v1152_v11 = vmax.f32 %v1146_v6, 0.0  ;;  %v1149_v12 = vadd.f32 %v1534_v3, %v1148_v10  ;;  %v1738_v13 = vpop.f32.mrb[11].mxu1  ;;  %v913_v3 = vrot.slane %v912_v59, 1 }
 0xb8b   :  { %1158 = vst.msk [vmem:[#allocation2 + $0x3] sm:$0xff] %vm163_vm3, %v1152_v11  ;;  %v1153_v15 = vmax.f32 %v1149_v12, 0.0  ;;  %v914_v5 = vadd.f32 %v913_v3, %v912_v59 }
 0xb8d   :  { %1159 = vst.msk [vmem:[#allocation2 + $0x23] sm:$0xff] %vm163_vm3, %v1153_v15  ;;  %v916_v6 = vmul.f32 0.0625, %v914_v5 }
 0xb8f   :  { %v917_v9 = vadd.f32 1e-07, %v916_v6 }
 0xb91   :  { %1906 = vlog2.f32 %v917_v9 }
 0xb92   :  { %v1162_v17 = vld [vmem:[#allocation2 + $0x3] sm:$0xff] }
 0xb93   :  { %v1164_v18 = vld [vmem:[#allocation2 + $0x6] sm:$0xff] }
 0xb94   :  { %v1160_v19 = vld [vmem:[#allocation2] sm:$0xff]  ;;  %1290 = vst.msk [vmem:[#allocation2 + $0x9] sm:$0x1] %vm158_vm2, %v1958_v8 }
 0xb95   :  { %1288 = vst.msk [vmem:[#allocation2] sm:$0x1] %vm158_vm2, %v1958_v8  ;;  %v1163_v21 = vld [vmem:[#allocation2 + $0x23] sm:$0xff] }
 0xb96   :  { %v1165_v22 = vld [vmem:[#allocation2 + $0x26] sm:$0xff]  ;;  %v1833_v24 = vpack.i.bf16 %v1163_v21, %v1162_v17 }
 0xb97   :  { %v1161_v23 = vld [vmem:[#allocation2 + $0x20] sm:$0xff]  ;;  %1291 = vst.msk [vmem:[#allocation2 + $0x29] sm:$0x1] %vm158_vm2, %v1958_v8  ;;  %v1838_v25 = vpack.i.bf16 %v1165_v22, %v1164_v18 }
 0xb98   :  { %1289 = vst.msk [vmem:[#allocation2 + $0x20] sm:$0x1] %vm158_vm2, %v1958_v8  ;;  %1834 = vrot.lane.b32.xlu1 %v1833_v24, %s1960_s5 }
 0xb9b   :  { %v1907_v10 = vpop.eup %1906 }
 0xb9c   :  { %1839 = vrot.lane.b32.xlu1 %v1838_v25, %s1961_s0  ;;  %v919_v11 = vmul.f32 0.6931472, %v1907_v10 }
 0xb9e   :  { %v920_v12 = vmul.f32 %v919_v11, %v916_v6 }
 0xba0   :  { %v921_v13 = vsel %vm197_vm6, %v920_v12, 0.0 }
 0xc0a   :  { %v1835_v26 = vpop.permute.xlu1 %1834 }
 0xc0b   :  { %v1837_v27 = vunpack.i.h.bf16 %v1835_v26  ;;  %v1836_v28 = vunpack.i.l.bf16 %v1835_v26 }
 0xc0d   :  { %v1182_v33 = vsel %vm163_vm3, %v1160_v19, %v1836_v28  ;;  %v1183_v7 = vsel %vm163_vm3, %v1161_v23, %v1837_v27 }
 0xc0e   :  { %v1840_v29 = vpop.permute.xlu1 %1839 }
 0xc0f   :  { %v1842_v30 = vunpack.i.h.bf16 %v1840_v29  ;;  %v1841_v32 = vunpack.i.l.bf16 %v1840_v29 }
 0xc11   :  { %v1184_v4 = vsel %vm197_vm6, %v1182_v33, %v1841_v32  ;;  %v1185_v34 = vsel %vm197_vm6, %v1183_v7, %v1842_v30 }
 0xc12   :  { %v1186_v8 = vpack.c.bf16 %v1185_v34, %v1184_v4 }
 0xc14   :  { %1752 = vmatmul.mubr.msk.bf16.vlgmr.msra.gmra.mrb[20].mxu0 %vm256_vm7, %v1186_v8 }
 0xce7   :  { %v1279_v47 = vpop.f32.mrb[20].mxu0 }
 0xce8   :  { %v1280_v48 = vadd.f32 %v1542_v45, %v1279_v47  ;;  %v1753_v49 = vpop.f32.mrb[21].mxu0 }
 0xce9   :  { %v1282_v50 = vpop.f32.mrb[22].mxu0 }
 0xcea   :  { %v1286_v52 = vmax.f32 %v1280_v48, 0.0  ;;  %v1283_v53 = vadd.f32 %v1542_v45, %v1282_v50  ;;  %v1754_v54 = vpop.f32.mrb[23].mxu0 }
 0xcec   :  { %1292 = vst.msk [vmem:[#allocation2 + $0x1] sm:$0xff] %vm163_vm3, %v1286_v52  ;;  %v1287_v56 = vmax.f32 %v1283_v53, 0.0 }
 0xcee   :  { %1293 = vst.msk [vmem:[#allocation2 + $0x21] sm:$0xff] %vm163_vm3, %v1287_v56 }
 0xcf3   :  { %v1298_v61 = vld [vmem:[#allocation2 + $0x2] sm:$0xff] }
 0xcf4   :  { %v1296_v63 = vld [vmem:[#allocation2 + $0x1] sm:$0xff] }
 0xcf5   :  { %v1299_v62 = vld [vmem:[#allocation2 + $0x22] sm:$0xff] }
 0xcf6   :  { %v1297_v0 = vld [vmem:[#allocation2 + $0x21] sm:$0xff]  ;;  %v1848_v1 = vpack.i.bf16 %v1299_v62, %v1298_v61 }
 0xcf7   :  { %v1843_v2 = vpack.i.bf16 %v1297_v0, %v1296_v63  ;;  %v1294_v21 = vld [vmem:[#allocation2] sm:$0xff] }
 0xcf8   :  { %1849 = vrot.lane.b32.xlu1 %v1848_v1, %s1961_s0  ;;  %v1295_v22 = vld [vmem:[#allocation2 + $0x20] sm:$0xff] }
 0xcf9   :  { %1844 = vrot.lane.b32.xlu0 %v1843_v2, %s1960_s5  ;;  %s1465_s5 = sshll.u32 %s1963_s20, 4  ;;  %s1466_s5 = int_to_ptr.vmem [resolvable:$true] %s1465_s5 }
 0xcfa   :  { %s1910_s4 = scalar_lea.vmem %s1466_s5, 16  ;;  %s1914_s10 = scalar_lea.vmem %s1466_s5, 32 }
 0xcfb   :  { %p1911_p0 = scmp.ne.s32.totalorder %s1466_s5, %s1910_s4  ;;  %p1915_p1 = scmp.lt.s32.totalorder %s1466_s5, %s1466_s5 }
 0xcfc   :  { %p1916_p2 = scmp.lt.s32.totalorder %s1914_s10, %s1910_s4 }
 0xcfe   :  { %p1917_p3 = por %p1916_p2, %p1915_p1 }
 0xd00   :  { %p1918_p4 = pnand %p1917_p3, %p1911_p0 }
 0xd18   :  { %894 = vadd.xlane.f32.xlu0 %v2388_v31 }
 0xd1c   :  { %922 = vadd.xlane.f32.xlu1 %v921_v13 }
 0xd6a   :  { %v1850_v14 = vpop.permute.xlu1 %1849 }
 0xd6b   :  { %v1845_v15 = vpop.permute.xlu0 %1844  ;;  %v1852_v16 = vunpack.i.h.bf16 %v1850_v14  ;;  %v1851_v17 = vunpack.i.l.bf16 %v1850_v14 }
 0xd6c   :  { %v1847_v18 = vunpack.i.h.bf16 %v1845_v15  ;;  %v1846_v19 = vunpack.i.l.bf16 %v1845_v15 }
 0xd6e   :  { %v1316_v23 = vsel %vm163_vm3, %v1294_v21, %v1846_v19  ;;  %v1317_v24 = vsel %vm163_vm3, %v1295_v22, %v1847_v18 }
 0xd6f   :  { %v1318_v25 = vsel %vm197_vm6, %v1316_v23, %v1851_v17  ;;  %v1319_v31 = vsel %vm197_vm6, %v1317_v24, %v1852_v16 }
 0xd70   :  { %v1320_v26 = vpack.c.bf16 %v1319_v31, %v1318_v25 }
 0xd72   :  { %1562 = vmatmul.mubr.msk.bf16.vlgmr.msra.gmra.mrb[12].mxu1 %vm256_vm7, %v1320_v26 }
 0xda5   :  { %v895_v27 = vpop.xlane.xlu0 %894 }
 0xda6   :  { %v896_v28 = vrot.slane %v895_v27, 4 }
 0xda8   :  { %v897_v29 = vadd.f32 %v896_v28, %v895_v27 }
 0xda9   :  { %v923_v4 = vpop.xlane.xlu1 %922 }
 0xdaa   :  { %v898_v30 = vrot.slane %v897_v29, 2 }
 0xdac   :  { %v899_v32 = vadd.f32 %v898_v30, %v897_v29 }
 0xdae   :  { %v900_v33 = vrot.slane %v899_v32, 1 }
 0xdb0   :  { %v901_v7 = vadd.f32 %v900_v33, %v899_v32 }
 0xdb2   :  { %1780 = vpush %v901_v7 }
 0xdb3   :  { %1782 = vpush %v923_v4 }
 0xde3   :  { %s1781_s0 = spop %1780 }
 0xde4   :  { %s905_s1 = smul.f32 0.001953125, %s1781_s0  ;;  %s1783_s8 = spop %1782 }
 0xde5   :  { %s925_s27 = ssub.f32 0.0, %s1783_s8 }
 0xde6   :  { %v943_v34 = vstv %s905_s1 }
 0xde7   :  { %v926_v8 = vstv %s925_s27  ;;  %945 = vst.msk [vmem:[#allocation3] sm:$0x1] %vm944_vm0, %v943_v34 }
 0xde8   :  { %v927_v35 = vmul.f32 1.442695, %v926_v8 }
 0xde9   :  { %1921 = shalt.err (!%p1918_p4)
}
 0xdea   :  { %s1922_s15 = scalar_lea.hbm %s2595_s24, 16 }
 0xdeb   :  { %p1923_p5 = scmp.ne.s32.totalorder %s2595_s24, %s1922_s15  ;;  %p1926_p6 = scmp.lt.u32.totalorder %s1922_s15, %s2595_s24 }
 0xded   :  { %p1928_p7 = pnand %p1926_p6, %p1923_p5 }
 0xdef   :  { %1931 = shalt.err (!%p1928_p7)
}
 0xdf0   :  { %1468 = dma.vmem_to_hbm [thread:$0]  %s1466_s5, 16, %s2595_s24, [#allocation4]   ;;  %1908 = vpow2.f32 %v927_v35 }
 0xdf1   :  { %s1964_s14 = smov [#allocation5]  }
 0xdf2   :  { %s1475_s23 = sshll.u32 %s1964_s14, 4  ;;  %s1476_s23 = int_to_ptr.vmem [resolvable:$true] %s1475_s23 }
 0xdf3   :  { %s1932_s6 = scalar_lea.vmem %s1476_s23, 16  ;;  %s1936_s7 = scalar_lea.vmem %s1476_s23, 32 }
 0xdf4   :  { %p1933_p8 = scmp.ne.s32.totalorder %s1476_s23, %s1932_s6  ;;  %p1937_p9 = scmp.lt.s32.totalorder %s1476_s23, %s1476_s23 }
 0xdf5   :  { %p1938_p10 = scmp.lt.s32.totalorder %s1936_s7, %s1932_s6 }
 0xdf7   :  { %p1939_p11 = por %p1938_p10, %p1937_p9 }
 0xdf9   :  { %p1940_p12 = pnand %p1939_p11, %p1933_p8 }
 0xdfa   :  { %v1909_v36 = vpop.eup %1908 }
 0xdfb   :  { %1784 = vpush %v1909_v36 }
 0xe2c   :  { %s1785_s30 = spop %1784 }
 0xe2d   :  { %v946_v37 = vstv %s1785_s30 }
 0xe2e   :  { %947 = vst.msk [vmem:[#allocation5] sm:$0x1] %vm944_vm0, %v946_v37 }
 0xe2f   :  { %1943 = shalt.err (!%p1940_p12)
}
 0xe30   :  { %s1944_s26 = scalar_lea.hbm %s2596_s25, 16 }
 0xe31   :  { %p1945_p13 = scmp.ne.s32.totalorder %s2596_s25, %s1944_s26  ;;  %p1948_p0 = scmp.lt.u32.totalorder %s1944_s26, %s2596_s25 }
 0xe33   :  { %p1950_p1 = pnand %p1948_p0, %p1945_p13 }
 0xe35   :  { %1953 = shalt.err (!%p1950_p1)
}
 0xe36   :  { %1478 = dma.vmem_to_hbm [thread:$0]  %s1476_s23, 16, %s2596_s25, [#allocation6]   ;;  %v1337_v38 = vsub.s32 0, %v2352_v60  ;;  %v1333_v39 = vld [vmem:[%s2592_s21] sm:$0x3]  ;;  %v1341_v40 = vsub.s32 1, %v2352_v60 }
 0xe38   :  { %v1338_v41 = vrot.slane %v1333_v39, %v1337_v38  ;;  %v1342_v42 = vrot.slane %v1333_v39, %v1341_v40 }
 0xe45   :  { %v1442_v43 = vpop.f32.mrb[12].mxu1 }
 0xe46   :  { %v1443_v44 = vadd.f32 %v1442_v43, %v1338_v41  ;;  %v1444_v45 = vpop.f32.mrb[13].mxu1 }
 0xe47   :  { %v1445_v46 = vadd.f32 %v1444_v45, %v1342_v42  ;;  %v1446_v47 = vpop.f32.mrb[14].mxu1 }
 0xe48   :  { %1451 = vst [vmem:[%s2593_s22] sm:$0xff] %v1443_v44  ;;  %v1447_v48 = vadd.f32 %v1446_v47, %v1338_v41  ;;  %v1448_v49 = vpop.f32.mrb[15].mxu1 }
 0xe49   :  { %1452 = vst [vmem:[%s2593_s22 + $0x8] sm:$0xff] %v1445_v46  ;;  %v1449_v50 = vadd.f32 %v1448_v49, %v1342_v42 }
 0xe4a   :  { %1453 = vst [vmem:[%s2593_s22 + $0x10] sm:$0xff] %v1447_v48 }
 0xe4b   :  { %1454 = vst [vmem:[%s2593_s22 + $0x18] sm:$0xff] %v1449_v50 }
 0xe4c   :  { %1954 = dma.done.wait [#allocation4], 16  }
 0xe4d   :  { %1955 = vsyncadd [#allocation4], 4294967280 }
 0xe4e   :  { %1956 = dma.done.wait [#allocation6], 16  }
 0xe4f   :  { %1957 = vsyncadd [#allocation6], 4294967280 }
 0xe50   :  { %1489 = vsyncpa [#allocation4], 1 }
 0xe51   :  { %1490 = vsyncpa [#allocation6], 1 }

</bundles_post_ra>
